<compile_context>
chip_gen: v7x
topology: tpu7x:2x2x1
jax: 0.10.0
libtpu: 0.0.40
codegen_flags: <defaults>
</compile_context>

<pallas_src>
import functools

import jax
import jax.numpy as jnp
from jax.experimental import pallas as pl
from jax.experimental.pallas import tpu as pltpu

SUBLANE = 8
LANE = 128


def _round_up(n, m):
    return ((n + m - 1) // m) * m


def _divisor_tile(dim, target, multiple):
    """Largest multiple of `multiple` <= min(target, dim) that divides `dim`.
    `dim` is always a multiple of `multiple` here, so this terminates."""
    t = max(multiple, (min(target, dim) // multiple) * multiple)
    while dim % t:
        t -= multiple
    return t


# ----------------------------------------------------------------------------
# Tiled linear kernel: out = x @ w_t + b, f32 accumulation directly into the
# output block (resident in VMEM across the k axis) -> no scratch accumulator.
# ----------------------------------------------------------------------------
def _linear_kernel(x_ref, w_ref, b_ref, o_ref):
    @pl.when(pl.program_id(2) == 0)
    def _():
        # Initialize the resident output block with the bias (folded once).
        o_ref[...] = jnp.broadcast_to(b_ref[...], o_ref.shape)

    o_ref[...] += jnp.dot(x_ref[...], w_ref[...], preferred_element_type=jnp.float32)


def linear(x, w_t, b, *, tm=256, tn=512, tk=512):
    """x: (N, K); w_t: (K, V) already transposed; b: (1, V). Returns (N, V) f32."""
    N, K = x.shape
    V = w_t.shape[1]
    tm = _divisor_tile(N, tm, SUBLANE)
    tn = _divisor_tile(V, tn, LANE)
    tk = _divisor_tile(K, tk, LANE)
    grid = (N // tm, V // tn, K // tk)
    return pl.pallas_call(
        _linear_kernel,
        out_shape=jax.ShapeDtypeStruct((N, V), jnp.float32),
        grid_spec=pltpu.PrefetchScalarGridSpec(
            num_scalar_prefetch=0,
            grid=grid,
            in_specs=[
                pl.BlockSpec((tm, tk), lambda i, j, k: (i, k)),
                pl.BlockSpec((tk, tn), lambda i, j, k: (k, j)),
                # Bias index depends only on j, so the pipeline does not
                # re-DMA it across the inner k loop.
                pl.BlockSpec((1, tn), lambda i, j, k: (0, j)),
            ],
            out_specs=pl.BlockSpec((tm, tn), lambda i, j, k: (i, j)),
        ),
        compiler_params=pltpu.CompilerParams(
            dimension_semantics=("parallel", "parallel", "arbitrary"),
        ),
    )(x, w_t, b)


# ----------------------------------------------------------------------------
# LSTM recurrence kernel: streamed per-time-chunk gates in, h chunk out,
# h/c state persistent in VMEM scratch across grid iterations.
# ----------------------------------------------------------------------------
def _lstm_recurrence_kernel(gates_ref, whh_ref, out_ref, h_scr, c_scr, *, unroll):
    # gates_ref: (Tc, Bc, 4*Hp) f32 (input projection, bias already folded in)
    # whh_ref:   (Hp, 4*Hp) matmul dtype (f32 or bf16), pre-transposed
    # out_ref:   (Tc, Bc, Hp) f32
    Bc, Hp = h_scr.shape
    Tc = gates_ref.shape[0]

    @pl.when(pl.program_id(1) == 0)  # first time-chunk of this batch chunk
    def _():
        h_scr[...] = jnp.zeros_like(h_scr)
        c_scr[...] = jnp.zeros_like(c_scr)

    mm_dtype = whh_ref.dtype

    def step(t, carry):
        h = h_scr[...]
        c = c_scr[...]
        # One small recurrent MXU matmul per step (latency bound); gate math
        # stays strictly f32 on VPU/EUP (important on v5e: no bf16 VPU/EUP).
        gates = gates_ref[t] + jnp.dot(
            h.astype(mm_dtype), whh_ref[...], preferred_element_type=jnp.float32
        )
        i_g = jax.nn.sigmoid(gates[:, 0 * Hp:1 * Hp])
        f_g = jax.nn.sigmoid(gates[:, 1 * Hp:2 * Hp])
        g_g = jnp.tanh(gates[:, 2 * Hp:3 * Hp])
        o_g = jax.nn.sigmoid(gates[:, 3 * Hp:4 * Hp])
        c_new = f_g * c + i_g * g_g
        h_new = o_g * jnp.tanh(c_new)
        c_scr[...] = c_new
        h_scr[...] = h_new
        out_ref[t] = h_new.astype(out_ref.dtype)
        return carry

    # Partial unroll: LLO scheduling visibility without full static unroll.
    jax.lax.fori_loop(0, Tc, step, 0, unroll=unroll)


def lstm_recurrence(gates, w_hh_t, *, time_chunk, batch_chunk):
    """gates: (T, Bp, 4*Hp) f32; w_hh_t: (Hp, 4*Hp). Returns (T, Bp, Hp) f32."""
    T, Bp, fourH = gates.shape
    Hp = w_hh_t.shape[0]
    nb = Bp // batch_chunk
    nt = T // time_chunk
    unroll = next(u for u in (8, 4, 2, 1) if time_chunk % u == 0)
    return pl.pallas_call(
        functools.partial(_lstm_recurrence_kernel, unroll=unroll),
        out_shape=jax.ShapeDtypeStruct((T, Bp, Hp), jnp.float32),
        grid_spec=pltpu.PrefetchScalarGridSpec(
            num_scalar_prefetch=0,
            grid=(nb, nt),
            in_specs=[
                pl.BlockSpec(
                    (time_chunk, batch_chunk, fourH), lambda bb, tt: (tt, bb, 0)
                ),
                pl.BlockSpec((Hp, fourH), lambda bb, tt: (0, 0)),
            ],
            out_specs=pl.BlockSpec(
                (time_chunk, batch_chunk, Hp), lambda bb, tt: (tt, bb, 0)
            ),
            scratch_shapes=[
                pltpu.VMEM((batch_chunk, Hp), jnp.float32),  # h (persists across chunks)
                pltpu.VMEM((batch_chunk, Hp), jnp.float32),  # c (persists across chunks)
            ],
        ),
        compiler_params=pltpu.CompilerParams(
            # Batch chunks are independent (shardable across v7x's 2 TCs);
            # time chunks carry the h/c recurrence -> sequential.
            dimension_semantics=("parallel", "arbitrary"),
        ),
    )(gates, w_hh_t)


def _pick_time_chunk(T, Bc, hp, max_bytes=4 << 20):
    """Largest Tc dividing T whose streamed per-chunk buffers (gates in + h out,
    double-buffered, f32) stay under max_bytes (VMEM-safe even on v7x)."""
    per_step = Bc * (4 * hp + hp) * 4 * 2
    tc = max(1, min(T, max_bytes // max(per_step, 1)))
    while T % tc:
        tc -= 1
    return tc


# ----------------------------------------------------------------------------
# Parameter init (PyTorch-like, unpadded) and packing (pad + transpose).
# ----------------------------------------------------------------------------
def init_textnet_params(key, dictionary_size, embedding_dim, hidden_dim):
    keys = jax.random.split(key, 16)
    params = {}
    params["embedding"] = jax.random.normal(
        keys[0], (dictionary_size, embedding_dim), jnp.float32
    )
    layer_dims = [
        (embedding_dim, hidden_dim),
        (hidden_dim, hidden_dim),
        (hidden_dim, embedding_dim),
    ]
    params["lstm"] = []
    kidx = 1
    for (din, h) in layer_dims:
        s = 1.0 / (h ** 0.5)
        w_ih = jax.random.uniform(keys[kidx], (4 * h, din), jnp.float32, -s, s)
        w_hh = jax.random.uniform(keys[kidx + 1], (4 * h, h), jnp.float32, -s, s)
        b_ih = jax.random.uniform(keys[kidx + 2], (4 * h,), jnp.float32, -s, s)
        b_hh = jax.random.uniform(keys[kidx + 3], (4 * h,), jnp.float32, -s, s)
        params["lstm"].append({"w_ih": w_ih, "w_hh": w_hh, "b_ih": b_ih, "b_hh": b_hh})
        kidx += 4
    s = 1.0 / (embedding_dim ** 0.5)
    params["proj_w"] = jax.random.uniform(
        keys[kidx], (dictionary_size, embedding_dim), jnp.float32, -s, s
    )
    params["proj_b"] = jax.random.uniform(
        keys[kidx + 1], (dictionary_size,), jnp.float32, -s, s
    )
    return params


def _pack_lstm(w_ih, w_hh, b_ih, b_hh, din_p, h_p):
    """Pad each gate block to h_p (gate slices stay lane-aligned at stride h_p)
    and transpose so the kernel contraction is K-major (no in-kernel .T)."""
    fourh, din = w_ih.shape
    h = fourh // 4
    wih = jnp.pad(w_ih.reshape(4, h, din), ((0, 0), (0, h_p - h), (0, din_p - din)))
    wih_t = wih.transpose(2, 0, 1).reshape(din_p, 4 * h_p)
    whh = jnp.pad(w_hh.reshape(4, h, h), ((0, 0), (0, h_p - h), (0, h_p - h)))
    whh_t = whh.transpose(2, 0, 1).reshape(h_p, 4 * h_p)
    b = jnp.pad((b_ih + b_hh).reshape(4, h), ((0, 0), (0, h_p - h)))
    return wih_t, whh_t, b.reshape(1, 4 * h_p)


def pack_textnet_params(raw):
    V, E = raw["embedding"].shape
    Ep, Vp = _round_up(E, LANE), _round_up(V, LANE)
    packed = {"embedding": jnp.pad(raw["embedding"], ((0, 0), (0, Ep - E)))}
    packed["lstm"] = []
    for lp in raw["lstm"]:
        din = lp["w_ih"].shape[1]
        h = lp["w_hh"].shape[1]
        wih_t, whh_t, b = _pack_lstm(
            lp["w_ih"], lp["w_hh"], lp["b_ih"], lp["b_hh"],
            _round_up(din, LANE), _round_up(h, LANE),
        )
        packed["lstm"].append({"w_ih_t": wih_t, "w_hh_t": whh_t, "b": b})
    packed["proj_w_t"] = jnp.pad(raw["proj_w"].T, ((0, Ep - E), (0, Vp - V)))
    packed["proj_b"] = jnp.pad(raw["proj_b"], ((0, Vp - V),)).reshape(1, Vp)
    return packed


# ----------------------------------------------------------------------------
# TextNet forward (forward=0, stochastic=False)
# ----------------------------------------------------------------------------
@functools.partial(
    jax.jit, static_argnames=("matmul_dtype", "time_chunk", "batch_chunk")
)
def textnet_forward(tokens, packed, matmul_dtype=jnp.float32, time_chunk=None,
                    batch_chunk=None):
    # tokens: (T, B) int32
    T, B = tokens.shape
    Bp = _round_up(B, SUBLANE)
    V = packed["embedding"].shape[0]  # rows are unpadded -> static vocab size

    # Batch chunking for the recurrence: default = whole padded batch on one
    # core (best for single-TC v5e/v6e); pass batch_chunk=Bp//2 on v7x to run
    # half the batch on each TensorCore.
    bc = Bp if batch_chunk is None else min(batch_chunk, Bp)
    bc = max(SUBLANE, (bc // SUBLANE) * SUBLANE)
    while Bp % bc:
        bc -= SUBLANE

    x = packed["embedding"][tokens]                 # (T, B, Ep) gather in JAX
    x = jnp.pad(x, ((0, 0), (0, Bp - B), (0, 0)))   # pad batch to sublane mult
    h2d = x.reshape(T * Bp, -1).astype(matmul_dtype)

    for lp in packed["lstm"]:
        hp = lp["w_hh_t"].shape[0]
        # 1) time-invariant input projection: big tiled/pipelined MXU matmul,
        #    bias folded once (runs on both TCs via parallel grid axes).
        gates = linear(h2d, lp["w_ih_t"].astype(matmul_dtype), lp["b"])
        gates = gates.reshape(T, Bp, 4 * hp)
        # 2) time-chunked recurrence with persistent h/c scratch.
        tc = _pick_time_chunk(T, bc, hp) if time_chunk is None else time_chunk
        tc = max(1, min(tc, T))
        while T % tc:
            tc -= 1
        h3d = lstm_recurrence(
            gates, lp["w_hh_t"].astype(matmul_dtype), time_chunk=tc, batch_chunk=bc
        )
        h2d = h3d.reshape(T * Bp, hp).astype(matmul_dtype)

    logits = linear(h2d, packed["proj_w_t"].astype(matmul_dtype), packed["proj_b"])
    logits = logits.reshape(T, Bp, -1)
    return logits[:, :B, :V]


# ----------------------------------------------------------------------------
# Pure-JAX reference (unpadded params)
# ----------------------------------------------------------------------------
def _lstm_ref(x, w_ih, w_hh, b_ih, b_hh):
    T, B, _ = x.shape
    H = w_hh.shape[1]

    def step(carry, xt):
        h, c = carry
        gates = xt @ w_ih.T + h @ w_hh.T + b_ih + b_hh
        i = jax.nn.sigmoid(gates[:, 0 * H:1 * H])
        f = jax.nn.sigmoid(gates[:, 1 * H:2 * H])
        g = jnp.tanh(gates[:, 2 * H:3 * H])
        o = jax.nn.sigmoid(gates[:, 3 * H:4 * H])
        c = f * c + i * g
        h = o * jnp.tanh(c)
        return (h, c), h

    h0 = jnp.zeros((B, H), jnp.float32)
    c0 = jnp.zeros((B, H), jnp.float32)
    _, hs = jax.lax.scan(step, (h0, c0), x)
    return hs


def textnet_ref(tokens, raw):
    h = raw["embedding"][tokens]
    for lp in raw["lstm"]:
        h = _lstm_ref(h, lp["w_ih"], lp["w_hh"], lp["b_ih"], lp["b_hh"])
    T, B, E = h.shape
    logits = h.reshape(T * B, E) @ raw["proj_w"].T + raw["proj_b"]
    return logits.reshape(T, B, -1)


if __name__ == "__main__":
    dictionary_size = 32
    embedding_dim = 16
    hidden_dim = 32
    T, B = 8, 10  # B=10 -> Bp=16 exercises batch chunking + padded-batch slice

    key = jax.random.PRNGKey(0)
    pkey, tkey = jax.random.split(key)
    raw_params = init_textnet_params(pkey, dictionary_size, embedding_dim, hidden_dim)
    packed_params = pack_textnet_params(raw_params)
    tokens = jax.random.randint(tkey, (T, B), 0, dictionary_size, dtype=jnp.int32)

    ref = textnet_ref(tokens, raw_params)

    # f32 path (strict numerical check). time_chunk=2 + batch_chunk=8 exercise
    # the multi-chunk streaming with persistent h/c scratch and the
    # batch-parallel grid axis.
    logits = jax.block_until_ready(
        textnet_forward(tokens, packed_params, matmul_dtype=jnp.float32,
                        time_chunk=2, batch_chunk=8)
    )
    assert logits.shape == (T, B, dictionary_size)
    assert jnp.allclose(logits, ref, atol=1e-4, rtol=1e-4), float(
        jnp.max(jnp.abs(logits - ref))
    )

    # bf16 MXU-operand path (v6e/v7x fast path): f32 accumulation, f32 h/c and
    # gate math; checked against the f32 reference with a looser tolerance.
    logits_bf16 = jax.block_until_ready(
        textnet_forward(tokens, packed_params, matmul_dtype=jnp.bfloat16,
                        time_chunk=2, batch_chunk=8)
    )
    assert logits_bf16.shape == (T, B, dictionary_size)
    assert jnp.allclose(logits_bf16, ref, atol=5e-2, rtol=5e-2), float(
        jnp.max(jnp.abs(logits_bf16 - ref))
    )

    print("KERNEL_OK")
</pallas_src>

<mosaic_0001>
module attributes {stable_mosaic.version = 11 : i64} {
  func.func @_linear_kernel(%arg0: i32, %arg1: i32, %arg2: i32, %arg3: memref<128x128xf32, #tpu.memory_space<vmem>>, %arg4: memref<128x512xf32, #tpu.memory_space<vmem>>, %arg5: memref<1x512xf32, #tpu.memory_space<vmem>>, %arg6: memref<128x512xf32, #tpu.memory_space<vmem>>) attributes {dimension_semantics = [#tpu.dimension_semantics<parallel>, #tpu.dimension_semantics<parallel>, #tpu.dimension_semantics<arbitrary>], iteration_bounds = array<i64: 1, 1, 1>, scalar_prefetch = 0 : i64, scratch_operands = 0 : i64, tpu.core_type = #tpu.core_type<tc>, window_params = [{transform_indices = @transform_0, window_bounds = array<i64: 128, 128>}, {transform_indices = @transform_1, window_bounds = array<i64: 128, 512>}, {transform_indices = @transform_2, window_bounds = array<i64: 1, 512>}, {transform_indices = @transform_3, window_bounds = array<i64: 128, 512>}]} {
    %c0_i32 = arith.constant 0 : i32
    %0 = arith.cmpi eq, %arg2, %c0_i32 : i32
    %1 = arith.extui %0 : i1 to i32
    %c0_i32_0 = arith.constant 0 : i32
    %2 = arith.cmpi ne, %1, %c0_i32_0 : i32
    scf.if %2 {
      %c0_8 = arith.constant 0 : index
      %c0_9 = arith.constant 0 : index
      %9 = vector.load %arg5[%c0_8, %c0_9] : memref<1x512xf32, #tpu.memory_space<vmem>>, vector<1x512xf32>
      %10 = vector.shape_cast %9 : vector<1x512xf32> to vector<1x512xf32>
      %11 = vector.broadcast %10 : vector<1x512xf32> to vector<128x512xf32>
      %c0_10 = arith.constant 0 : index
      %c0_11 = arith.constant 0 : index
      %12 = vector.load %arg6[%c0_10, %c0_11] : memref<128x512xf32, #tpu.memory_space<vmem>>, vector<128x512xf32>
      tpu.vector_store %arg6[%c0_10, %c0_11], %11 {strides = array<i32>} : memref<128x512xf32, #tpu.memory_space<vmem>>, vector<128x512xf32>,
    } else {
    }
    %c0 = arith.constant 0 : index
    %c0_1 = arith.constant 0 : index
    %3 = vector.load %arg6[%c0, %c0_1] : memref<128x512xf32, #tpu.memory_space<vmem>>, vector<128x512xf32>
    %c0_2 = arith.constant 0 : index
    %c0_3 = arith.constant 0 : index
    %4 = vector.load %arg3[%c0_2, %c0_3] : memref<128x128xf32, #tpu.memory_space<vmem>>, vector<128x128xf32>
    %c0_4 = arith.constant 0 : index
    %c0_5 = arith.constant 0 : index
    %5 = vector.load %arg4[%c0_4, %c0_5] : memref<128x512xf32, #tpu.memory_space<vmem>>, vector<128x512xf32>
    %cst = arith.constant dense<0.000000e+00> : vector<128x512xf32>
    %6 = tpu.matmul %4, %5, %cst {dimension_numbers = #tpu.dot_dimension_numbers<[1], [0], [0], [1], [0, 0, 1, 1], [], []>} : vector<128x128xf32>, vector<128x512xf32>, vector<128x512xf32> -> vector<128x512xf32>
    %7 = arith.addf %3, %6 : vector<128x512xf32>
    %c0_6 = arith.constant 0 : index
    %c0_7 = arith.constant 0 : index
    %8 = vector.load %arg6[%c0_6, %c0_7] : memref<128x512xf32, #tpu.memory_space<vmem>>, vector<128x512xf32>
    tpu.vector_store %arg6[%c0_6, %c0_7], %7 {strides = array<i32>} : memref<128x512xf32, #tpu.memory_space<vmem>>, vector<128x512xf32>,
    return
  }
  func.func @transform_0(%arg0: i32, %arg1: i32, %arg2: i32) -> (i32, i32) {
    %c0_i32 = arith.constant 0 : i32
    return %arg0, %arg2 : i32, i32
  }
  func.func @transform_1(%arg0: i32, %arg1: i32, %arg2: i32) -> (i32, i32) {
    %c0_i32 = arith.constant 0 : i32
    return %arg2, %arg1 : i32, i32
  }
  func.func @transform_2(%arg0: i32, %arg1: i32, %arg2: i32) -> (i32, i32) {
    %c0_i32 = arith.constant 0 : i32
    %c0_i32_0 = arith.constant 0 : i32
    return %c0_i32, %arg1 : i32, i32
  }
  func.func @transform_3(%arg0: i32, %arg1: i32, %arg2: i32) -> (i32, i32) {
    %c0_i32 = arith.constant 0 : i32
    return %arg0, %arg1 : i32, i32
  }
}

module attributes {stable_mosaic.version = 11 : i64} {
  func.func @_linear_kernel(%arg0: i32, %arg1: i32, %arg2: i32, %arg3: memref<128x128xf32, #tpu.memory_space<vmem>>, %arg4: memref<128x128xf32, #tpu.memory_space<vmem>>, %arg5: memref<1x128xf32, #tpu.memory_space<vmem>>, %arg6: memref<128x128xf32, #tpu.memory_space<vmem>>) attributes {dimension_semantics = [#tpu.dimension_semantics<parallel>, #tpu.dimension_semantics<parallel>, #tpu.dimension_semantics<arbitrary>], iteration_bounds = array<i64: 1, 1, 1>, scalar_prefetch = 0 : i64, scratch_operands = 0 : i64, tpu.core_type = #tpu.core_type<tc>, window_params = [{transform_indices = @transform_0, window_bounds = array<i64: 128, 128>}, {transform_indices = @transform_1, window_bounds = array<i64: 128, 128>}, {transform_indices = @transform_2, window_bounds = array<i64: 1, 128>}, {transform_indices = @transform_3, window_bounds = array<i64: 128, 128>}]} {
    %c0_i32 = arith.constant 0 : i32
    %0 = arith.cmpi eq, %arg2, %c0_i32 : i32
    %1 = arith.extui %0 : i1 to i32
    %c0_i32_0 = arith.constant 0 : i32
    %2 = arith.cmpi ne, %1, %c0_i32_0 : i32
    scf.if %2 {
      %c0_8 = arith.constant 0 : index
      %c0_9 = arith.constant 0 : index
      %9 = vector.load %arg5[%c0_8, %c0_9] : memref<1x128xf32, #tpu.memory_space<vmem>>, vector<1x128xf32>
      %10 = vector.shape_cast %9 : vector<1x128xf32> to vector<1x128xf32>
      %11 = vector.broadcast %10 : vector<1x128xf32> to vector<128x128xf32>
      %c0_10 = arith.constant 0 : index
      %c0_11 = arith.constant 0 : index
      %12 = vector.load %arg6[%c0_10, %c0_11] : memref<128x128xf32, #tpu.memory_space<vmem>>, vector<128x128xf32>
      tpu.vector_store %arg6[%c0_10, %c0_11], %11 {strides = array<i32>} : memref<128x128xf32, #tpu.memory_space<vmem>>, vector<128x128xf32>,
    } else {
    }
    %c0 = arith.constant 0 : index
    %c0_1 = arith.constant 0 : index
    %3 = vector.load %arg6[%c0, %c0_1] : memref<128x128xf32, #tpu.memory_space<vmem>>, vector<128x128xf32>
    %c0_2 = arith.constant 0 : index
    %c0_3 = arith.constant 0 : index
    %4 = vector.load %arg3[%c0_2, %c0_3] : memref<128x128xf32, #tpu.memory_space<vmem>>, vector<128x128xf32>
    %c0_4 = arith.constant 0 : index
    %c0_5 = arith.constant 0 : index
    %5 = vector.load %arg4[%c0_4, %c0_5] : memref<128x128xf32, #tpu.memory_space<vmem>>, vector<128x128xf32>
    %cst = arith.constant dense<0.000000e+00> : vector<128x128xf32>
    %6 = tpu.matmul %4, %5, %cst {dimension_numbers = #tpu.dot_dimension_numbers<[1], [0], [0], [1], [0, 0, 1, 1], [], []>} : vector<128x128xf32>, vector<128x128xf32>, vector<128x128xf32> -> vector<128x128xf32>
    %7 = arith.addf %3, %6 : vector<128x128xf32>
    %c0_6 = arith.constant 0 : index
    %c0_7 = arith.constant 0 : index
    %8 = vector.load %arg6[%c0_6, %c0_7] : memref<128x128xf32, #tpu.memory_space<vmem>>, vector<128x128xf32>
    tpu.vector_store %arg6[%c0_6, %c0_7], %7 {strides = array<i32>} : memref<128x128xf32, #tpu.memory_space<vmem>>, vector<128x128xf32>,
    return
  }
  func.func @transform_0(%arg0: i32, %arg1: i32, %arg2: i32) -> (i32, i32) {
    %c0_i32 = arith.constant 0 : i32
    return %arg0, %arg2 : i32, i32
  }
  func.func @transform_1(%arg0: i32, %arg1: i32, %arg2: i32) -> (i32, i32) {
    %c0_i32 = arith.constant 0 : i32
    return %arg2, %arg1 : i32, i32
  }
  func.func @transform_2(%arg0: i32, %arg1: i32, %arg2: i32) -> (i32, i32) {
    %c0_i32 = arith.constant 0 : i32
    %c0_i32_0 = arith.constant 0 : i32
    return %c0_i32, %arg1 : i32, i32
  }
  func.func @transform_3(%arg0: i32, %arg1: i32, %arg2: i32) -> (i32, i32) {
    %c0_i32 = arith.constant 0 : i32
    return %arg0, %arg1 : i32, i32
  }
}

module attributes {stable_mosaic.version = 11 : i64} {
  func.func @_lstm_recurrence_kernel(%arg0: i32, %arg1: i32, %arg2: memref<2x8x512xf32, #tpu.memory_space<vmem>>, %arg3: memref<128x512xf32, #tpu.memory_space<vmem>>, %arg4: memref<2x8x128xf32, #tpu.memory_space<vmem>>, %arg5: memref<8x128xf32, #tpu.memory_space<vmem>>, %arg6: memref<8x128xf32, #tpu.memory_space<vmem>>) attributes {dimension_semantics = [#tpu.dimension_semantics<parallel>, #tpu.dimension_semantics<arbitrary>], iteration_bounds = array<i64: 2, 4>, scalar_prefetch = 0 : i64, scratch_operands = 2 : i64, tpu.core_type = #tpu.core_type<tc>, window_params = [{transform_indices = @transform_0, window_bounds = array<i64: 2, 8, 512>}, {pipeline_mode = #tpu.pipeline_mode<synchronous>, transform_indices = @transform_1, window_bounds = array<i64: 128, 512>}, {transform_indices = @transform_2, window_bounds = array<i64: 2, 8, 128>}]} {
    %c0_i32 = arith.constant 0 : i32
    %0 = arith.cmpi eq, %arg1, %c0_i32 : i32
    %1 = arith.extui %0 : i1 to i32
    %c0_i32_0 = arith.constant 0 : i32
    %2 = arith.cmpi ne, %1, %c0_i32_0 : i32
    scf.if %2 {
      %cst_36 = arith.constant 0.000000e+00 : f32
      %81 = vector.broadcast %cst_36 : f32 to vector<8x128xf32>
      %c0_37 = arith.constant 0 : index
      %c0_38 = arith.constant 0 : index
      %82 = vector.load %arg5[%c0_37, %c0_38] : memref<8x128xf32, #tpu.memory_space<vmem>>, vector<8x128xf32>
      tpu.vector_store %arg5[%c0_37, %c0_38], %81 {strides = array<i32>} : memref<8x128xf32, #tpu.memory_space<vmem>>, vector<8x128xf32>,
      %cst_39 = arith.constant 0.000000e+00 : f32
      %83 = vector.broadcast %cst_39 : f32 to vector<8x128xf32>
      %c0_40 = arith.constant 0 : index
      %c0_41 = arith.constant 0 : index
      %84 = vector.load %arg6[%c0_40, %c0_41] : memref<8x128xf32, #tpu.memory_space<vmem>>, vector<8x128xf32>
      tpu.vector_store %arg6[%c0_40, %c0_41], %83 {strides = array<i32>} : memref<8x128xf32, #tpu.memory_space<vmem>>, vector<8x128xf32>,
    } else {
    }
    %c0_i32_1 = arith.constant 0 : i32
    %c0 = arith.constant 0 : index
    %c0_2 = arith.constant 0 : index
    %3 = vector.load %arg5[%c0, %c0_2] : memref<8x128xf32, #tpu.memory_space<vmem>>, vector<8x128xf32>
    %c0_3 = arith.constant 0 : index
    %c0_4 = arith.constant 0 : index
    %4 = vector.load %arg6[%c0_3, %c0_4] : memref<8x128xf32, #tpu.memory_space<vmem>>, vector<8x128xf32>
    %5 = arith.index_cast %c0_i32_1 : i32 to index
    %c0_5 = arith.constant 0 : index
    %c0_6 = arith.constant 0 : index
    %6 = vector.load %arg2[%5, %c0_5, %c0_6] : memref<2x8x512xf32, #tpu.memory_space<vmem>>, vector<1x8x512xf32>
    %7 = vector.shape_cast %6 : vector<1x8x512xf32> to vector<8x512xf32>
    %c0_7 = arith.constant 0 : index
    %c0_8 = arith.constant 0 : index
    %8 = vector.load %arg3[%c0_7, %c0_8] : memref<128x512xf32, #tpu.memory_space<vmem>>, vector<128x512xf32>
    %cst = arith.constant dense<0.000000e+00> : vector<8x512xf32>
    %9 = tpu.matmul %3, %8, %cst {dimension_numbers = #tpu.dot_dimension_numbers<[1], [0], [0], [1], [0, 0, 1, 1], [], []>} : vector<8x128xf32>, vector<128x512xf32>, vector<8x512xf32> -> vector<8x512xf32>
    %10 = arith.addf %7, %9 : vector<8x512xf32>
    %11 = vector.extract_strided_slice %10 {offsets = [0, 0], sizes = [8, 128], strides = [1, 1]} : vector<8x512xf32> to vector<8x128xf32>
    %12 = arith.negf %11 : vector<8x128xf32>
    %13 = math.exp %12 : vector<8x128xf32>
    %cst_9 = arith.constant 1.000000e+00 : f32
    %14 = vector.broadcast %cst_9 : f32 to vector<8x128xf32>
    %15 = arith.addf %14, %13 : vector<8x128xf32>
    %16 = arith.divf %14, %15 : vector<8x128xf32>
    %17 = vector.extract_strided_slice %10 {offsets = [0, 128], sizes = [8, 128], strides = [1, 1]} : vector<8x512xf32> to vector<8x128xf32>
    %18 = arith.negf %17 : vector<8x128xf32>
    %19 = math.exp %18 : vector<8x128xf32>
    %cst_10 = arith.constant 1.000000e+00 : f32
    %20 = vector.broadcast %cst_10 : f32 to vector<8x128xf32>
    %21 = arith.addf %20, %19 : vector<8x128xf32>
    %22 = arith.divf %20, %21 : vector<8x128xf32>
    %23 = vector.extract_strided_slice %10 {offsets = [0, 256], sizes = [8, 128], strides = [1, 1]} : vector<8x512xf32> to vector<8x128xf32>
    %24 = math.tanh %23 : vector<8x128xf32>
    %25 = vector.extract_strided_slice %10 {offsets = [0, 384], sizes = [8, 128], strides = [1, 1]} : vector<8x512xf32> to vector<8x128xf32>
    %26 = arith.negf %25 : vector<8x128xf32>
    %27 = math.exp %26 : vector<8x128xf32>
    %cst_11 = arith.constant 1.000000e+00 : f32
    %28 = vector.broadcast %cst_11 : f32 to vector<8x128xf32>
    %29 = arith.addf %28, %27 : vector<8x128xf32>
    %30 = arith.divf %28, %29 : vector<8x128xf32>
    %31 = arith.mulf %22, %4 : vector<8x128xf32>
    %32 = arith.mulf %16, %24 : vector<8x128xf32>
    %33 = arith.addf %31, %32 : vector<8x128xf32>
    %34 = math.tanh %33 : vector<8x128xf32>
    %35 = arith.mulf %30, %34 : vector<8x128xf32>
    %c0_12 = arith.constant 0 : index
    %c0_13 = arith.constant 0 : index
    %36 = vector.load %arg6[%c0_12, %c0_13] : memref<8x128xf32, #tpu.memory_space<vmem>>, vector<8x128xf32>
    tpu.vector_store %arg6[%c0_12, %c0_13], %33 {strides = array<i32>} : memref<8x128xf32, #tpu.memory_space<vmem>>, vector<8x128xf32>,
    %c0_14 = arith.constant 0 : index
    %c0_15 = arith.constant 0 : index
    %37 = vector.load %arg5[%c0_14, %c0_15] : memref<8x128xf32, #tpu.memory_space<vmem>>, vector<8x128xf32>
    tpu.vector_store %arg5[%c0_14, %c0_15], %35 {strides = array<i32>} : memref<8x128xf32, #tpu.memory_space<vmem>>, vector<8x128xf32>,
    %38 = arith.index_cast %c0_i32_1 : i32 to index
    %c0_16 = arith.constant 0 : index
    %c0_17 = arith.constant 0 : index
    %39 = vector.load %arg4[%38, %c0_16, %c0_17] : memref<2x8x128xf32, #tpu.memory_space<vmem>>, vector<1x8x128xf32>
    %40 = vector.shape_cast %39 : vector<1x8x128xf32> to vector<8x128xf32>
    %41 = vector.shape_cast %35 : vector<8x128xf32> to vector<1x8x128xf32>
    tpu.vector_store %arg4[%38, %c0_16, %c0_17], %41 {strides = array<i32>} : memref<2x8x128xf32, #tpu.memory_space<vmem>>, vector<1x8x128xf32>,
    %c1_i32 = arith.constant 1 : i32
    %c0_18 = arith.constant 0 : index
    %c0_19 = arith.constant 0 : index
    %42 = vector.load %arg5[%c0_18, %c0_19] : memref<8x128xf32, #tpu.memory_space<vmem>>, vector<8x128xf32>
    %c0_20 = arith.constant 0 : index
    %c0_21 = arith.constant 0 : index
    %43 = vector.load %arg6[%c0_20, %c0_21] : memref<8x128xf32, #tpu.memory_space<vmem>>, vector<8x128xf32>
    %44 = arith.index_cast %c1_i32 : i32 to index
    %c0_22 = arith.constant 0 : index
    %c0_23 = arith.constant 0 : index
    %45 = vector.load %arg2[%44, %c0_22, %c0_23] : memref<2x8x512xf32, #tpu.memory_space<vmem>>, vector<1x8x512xf32>
    %46 = vector.shape_cast %45 : vector<1x8x512xf32> to vector<8x512xf32>
    %c0_24 = arith.constant 0 : index
    %c0_25 = arith.constant 0 : index
    %47 = vector.load %arg3[%c0_24, %c0_25] : memref<128x512xf32, #tpu.memory_space<vmem>>, vector<128x512xf32>
    %cst_26 = arith.constant dense<0.000000e+00> : vector<8x512xf32>
    %48 = tpu.matmul %42, %47, %cst_26 {dimension_numbers = #tpu.dot_dimension_numbers<[1], [0], [0], [1], [0, 0, 1, 1], [], []>} : vector<8x128xf32>, vector<128x512xf32>, vector<8x512xf32> -> vector<8x512xf32>
    %49 = arith.addf %46, %48 : vector<8x512xf32>
    %50 = vector.extract_strided_slice %49 {offsets = [0, 0], sizes = [8, 128], strides = [1, 1]} : vector<8x512xf32> to vector<8x128xf32>
    %51 = arith.negf %50 : vector<8x128xf32>
    %52 = math.exp %51 : vector<8x128xf32>
    %cst_27 = arith.constant 1.000000e+00 : f32
    %53 = vector.broadcast %cst_27 : f32 to vector<8x128xf32>
    %54 = arith.addf %53, %52 : vector<8x128xf32>
    %55 = arith.divf %53, %54 : vector<8x128xf32>
    %56 = vector.extract_strided_slice %49 {offsets = [0, 128], sizes = [8, 128], strides = [1, 1]} : vector<8x512xf32> to vector<8x128xf32>
    %57 = arith.negf %56 : vector<8x128xf32>
    %58 = math.exp %57 : vector<8x128xf32>
    %cst_28 = arith.constant 1.000000e+00 : f32
    %59 = vector.broadcast %cst_28 : f32 to vector<8x128xf32>
    %60 = arith.addf %59, %58 : vector<8x128xf32>
    %61 = arith.divf %59, %60 : vector<8x128xf32>
    %62 = vector.extract_strided_slice %49 {offsets = [0, 256], sizes = [8, 128], strides = [1, 1]} : vector<8x512xf32> to vector<8x128xf32>
    %63 = math.tanh %62 : vector<8x128xf32>
    %64 = vector.extract_strided_slice %49 {offsets = [0, 384], sizes = [8, 128], strides = [1, 1]} : vector<8x512xf32> to vector<8x128xf32>
    %65 = arith.negf %64 : vector<8x128xf32>
    %66 = math.exp %65 : vector<8x128xf32>
    %cst_29 = arith.constant 1.000000e+00 : f32
    %67 = vector.broadcast %cst_29 : f32 to vector<8x128xf32>
    %68 = arith.addf %67, %66 : vector<8x128xf32>
    %69 = arith.divf %67, %68 : vector<8x128xf32>
    %70 = arith.mulf %61, %43 : vector<8x128xf32>
    %71 = arith.mulf %55, %63 : vector<8x128xf32>
    %72 = arith.addf %70, %71 : vector<8x128xf32>
    %73 = math.tanh %72 : vector<8x128xf32>
    %74 = arith.mulf %69, %73 : vector<8x128xf32>
    %c0_30 = arith.constant 0 : index
    %c0_31 = arith.constant 0 : index
    %75 = vector.load %arg6[%c0_30, %c0_31] : memref<8x128xf32, #tpu.memory_space<vmem>>, vector<8x128xf32>
    tpu.vector_store %arg6[%c0_30, %c0_31], %72 {strides = array<i32>} : memref<8x128xf32, #tpu.memory_space<vmem>>, vector<8x128xf32>,
    %c0_32 = arith.constant 0 : index
    %c0_33 = arith.constant 0 : index
    %76 = vector.load %arg5[%c0_32, %c0_33] : memref<8x128xf32, #tpu.memory_space<vmem>>, vector<8x128xf32>
    tpu.vector_store %arg5[%c0_32, %c0_33], %74 {strides = array<i32>} : memref<8x128xf32, #tpu.memory_space<vmem>>, vector<8x128xf32>,
    %77 = arith.index_cast %c1_i32 : i32 to index
    %c0_34 = arith.constant 0 : index
    %c0_35 = arith.constant 0 : index
    %78 = vector.load %arg4[%77, %c0_34, %c0_35] : memref<2x8x128xf32, #tpu.memory_space<vmem>>, vector<1x8x128xf32>
    %79 = vector.shape_cast %78 : vector<1x8x128xf32> to vector<8x128xf32>
    %80 = vector.shape_cast %74 : vector<8x128xf32> to vector<1x8x128xf32>
    tpu.vector_store %arg4[%77, %c0_34, %c0_35], %80 {strides = array<i32>} : memref<2x8x128xf32, #tpu.memory_space<vmem>>, vector<1x8x128xf32>,
    %c2_i32 = arith.constant 2 : i32
    return
  }
  func.func @transform_0(%arg0: i32, %arg1: i32) -> (i32, i32, i32) {
    %c0_i32 = arith.constant 0 : i32
    %c0_i32_0 = arith.constant 0 : i32
    return %arg1, %arg0, %c0_i32 : i32, i32, i32
  }
  func.func @transform_1(%arg0: i32, %arg1: i32) -> (i32, i32) {
    %c0_i32 = arith.constant 0 : i32
    %c0_i32_0 = arith.constant 0 : i32
    %c0_i32_1 = arith.constant 0 : i32
    return %c0_i32, %c0_i32_0 : i32, i32
  }
  func.func @transform_2(%arg0: i32, %arg1: i32) -> (i32, i32, i32) {
    %c0_i32 = arith.constant 0 : i32
    %c0_i32_0 = arith.constant 0 : i32
    return %arg1, %arg0, %c0_i32 : i32, i32, i32
  }
}

</mosaic_0001>

<bundles_post_ra>
// kernel: textnet_forward.13
= control target key start
LH: loop header
LB: loop body
LE: loop exit
PB: predicated region body
PF: predicated region fallthrough
CT: control target
= control target key end

     0   :  { %s574_s1 = inlined_call_operand.vmem [shape: f32[128,128], index: 1, kind: input, shape index: {}]   ;;  %s575_s0 = inlined_call_operand.vmem [shape: f32[128,128], index: 0, kind: input, shape index: {}]   ;;  %s576_s2 = inlined_call_operand.vmem [shape: f32[1,128], index: 2, kind: input, shape index: {}]   ;;  %s577_s3 = inlined_call_operand.vmem [shape: f32[128,128], index: 3, kind: output, shape index: {}]  }
   0x1   :  { %v73_v0 = vld [vmem:[%s574_s1] sm:$0xff]  ;;  %v74_v1 = vld [vmem:[%s574_s1 + $0x8] sm:$0xff]  ;;  %v75_v2 = vld [vmem:[%s574_s1 + $0x10] sm:$0xff] }
   0x2   :  { %v359_v3 = vpack.c.bf16 %v74_v1, %v73_v0  ;;  %v76_v4 = vld [vmem:[%s574_s1 + $0x18] sm:$0xff]  ;;  %v77_v6 = vld [vmem:[%s574_s1 + $0x20] sm:$0xff]  ;;  %v78_v7 = vld [vmem:[%s574_s1 + $0x28] sm:$0xff] }
   0x3   :  { %v363_v5 = vpack.c.bf16 %v76_v4, %v75_v2  ;;  %v367_v8 = vpack.c.bf16 %v78_v7, %v77_v6  ;;  %v57_v9 = vld [vmem:[%s575_s0] sm:$0xff]  ;;  %v79_v11 = vld [vmem:[%s574_s1 + $0x30] sm:$0xff]  ;;  %v80_v12 = vld [vmem:[%s574_s1 + $0x38] sm:$0xff] }
   0x4   :  { %360 = vmatprep.subr.bf16.mxu0 %v359_v3  ;;  %391 = vmatprep.subr.bf16.mxu1 %v359_v3  ;;  %v65_v10 = vld [vmem:[%s575_s0 + $0x40] sm:$0xff]  ;;  %v371_v13 = vpack.c.bf16 %v80_v12, %v79_v11  ;;  %v82_v15 = vld [vmem:[%s574_s1 + $0x48] sm:$0xff]  ;;  %v83_v17 = vld [vmem:[%s574_s1 + $0x50] sm:$0xff] }
   0x5   :  { %362 = vmatpush3.bf16.msra.mxu0 %v359_v3  ;;  %399 = vmatpush3.bf16.msra.mxu1 %v359_v3  ;;  %v81_v14 = vld [vmem:[%s574_s1 + $0x40] sm:$0xff]  ;;  %v84_v18 = vld [vmem:[%s574_s1 + $0x58] sm:$0xff]  ;;  %v86_v21 = vld [vmem:[%s574_s1 + $0x68] sm:$0xff] }
   0x6   :  { %364 = vmatprep.subr.bf16.mxu0 %v363_v5  ;;  %392 = vmatprep.subr.bf16.mxu1 %v363_v5  ;;  %v375_v16 = vpack.c.bf16 %v82_v15, %v81_v14  ;;  %v379_v19 = vpack.c.bf16 %v84_v18, %v83_v17  ;;  %v85_v20 = vld [vmem:[%s574_s1 + $0x60] sm:$0xff]  ;;  %v87_v23 = vld [vmem:[%s574_s1 + $0x70] sm:$0xff]  ;;  %v88_v24 = vld [vmem:[%s574_s1 + $0x78] sm:$0xff] }
   0x7   :  { %335 = vmatprep.mubr.f32.mxu0 %v57_v9  ;;  %347 = vmatprep.mubr.f32.mxu1 %v65_v10  ;;  %v383_v22 = vpack.c.bf16 %v86_v21, %v85_v20  ;;  %v387_v25 = vpack.c.bf16 %v88_v24, %v87_v23  ;;  %v58_v26 = vld [vmem:[%s575_s0 + $0x8] sm:$0xff]  ;;  %v59_v28 = vld [vmem:[%s575_s0 + $0x10] sm:$0xff]  ;;  %v60_v30 = vld [vmem:[%s575_s0 + $0x18] sm:$0xff] }
   0x8   :  { %v66_v27 = vld [vmem:[%s575_s0 + $0x48] sm:$0xff]  ;;  %v67_v29 = vld [vmem:[%s575_s0 + $0x50] sm:$0xff]  ;;  %v68_v31 = vld [vmem:[%s575_s0 + $0x58] sm:$0xff] }
   0x9   :  { %366 = vmatpush3.bf16.msra.mxu0 %v363_v5  ;;  %400 = vmatpush3.bf16.msra.mxu1 %v363_v5  ;;  %v61_v32 = vld [vmem:[%s575_s0 + $0x20] sm:$0xff]  ;;  %v62_v34 = vld [vmem:[%s575_s0 + $0x28] sm:$0xff]  ;;  %v63_v36 = vld [vmem:[%s575_s0 + $0x30] sm:$0xff] }
   0xa   :  { %368 = vmatprep.subr.bf16.mxu0 %v367_v8  ;;  %393 = vmatprep.subr.bf16.mxu1 %v367_v8  ;;  %v69_v33 = vld [vmem:[%s575_s0 + $0x60] sm:$0xff]  ;;  %v70_v35 = vld [vmem:[%s575_s0 + $0x68] sm:$0xff]  ;;  %v71_v37 = vld [vmem:[%s575_s0 + $0x70] sm:$0xff] }
   0xb   :  { %v64_v38 = vld [vmem:[%s575_s0 + $0x38] sm:$0xff]  ;;  %v270_v40 = vld [vmem:[%s576_s2] ss:$0 sm:$0xff] }
   0xc   :  { %v72_v39 = vld [vmem:[%s575_s0 + $0x78] sm:$0xff] }
   0xd   :  { %370 = vmatpush3.bf16.msra.mxu0 %v367_v8  ;;  %401 = vmatpush3.bf16.msra.mxu1 %v367_v8 }
   0xe   :  { %372 = vmatprep.subr.bf16.mxu0 %v371_v13  ;;  %394 = vmatprep.subr.bf16.mxu1 %v371_v13 }
  0x11   :  { %374 = vmatpush3.bf16.msra.mxu0 %v371_v13  ;;  %402 = vmatpush3.bf16.msra.mxu1 %v371_v13 }
  0x12   :  { %376 = vmatprep.subr.bf16.mxu0 %v375_v16  ;;  %395 = vmatprep.subr.bf16.mxu1 %v375_v16 }
  0x15   :  { %378 = vmatpush3.bf16.msra.mxu0 %v375_v16  ;;  %403 = vmatpush3.bf16.msra.mxu1 %v375_v16 }
  0x16   :  { %380 = vmatprep.subr.bf16.mxu0 %v379_v19  ;;  %396 = vmatprep.subr.bf16.mxu1 %v379_v19 }
  0x19   :  { %382 = vmatpush3.bf16.msra.mxu0 %v379_v19  ;;  %404 = vmatpush3.bf16.msra.mxu1 %v379_v19 }
  0x1a   :  { %384 = vmatprep.subr.bf16.mxu0 %v383_v22  ;;  %397 = vmatprep.subr.bf16.mxu1 %v383_v22 }
  0x1d   :  { %386 = vmatpush3.bf16.msra.mxu0 %v383_v22  ;;  %405 = vmatpush3.bf16.msra.mxu1 %v383_v22 }
  0x1e   :  { %388 = vmatprep.subr.bf16.mxu0 %v387_v25  ;;  %398 = vmatprep.subr.bf16.mxu1 %v387_v25 }
  0x21   :  { %390 = vmatpush3.bf16.msra.mxu0 %v387_v25  ;;  %406 = vmatpush3.bf16.msra.mxu1 %v387_v25 }
  0x24   :  { %336 = vmatmul.mubr.f32.vlgmr.msra.gmra.mrb[0].mxu0 %v58_v26  ;;  %348 = vmatmul.mubr.f32.vlgmr.msra.gmra.mrb[0].mxu1 %v66_v27 }
  0x25   :  { %338 = vmatprep.mubr.f32.mxu0 %v59_v28  ;;  %350 = vmatprep.mubr.f32.mxu1 %v67_v29 }
  0x28   :  { %339 = vmatmul.mubr.f32.gmra.mrb[2].mxu0 %v60_v30  ;;  %351 = vmatmul.mubr.f32.gmra.mrb[2].mxu1 %v68_v31 }
  0x29   :  { %341 = vmatprep.mubr.f32.mxu0 %v61_v32  ;;  %353 = vmatprep.mubr.f32.mxu1 %v69_v33 }
  0x2c   :  { %342 = vmatmul.mubr.f32.gmra.mrb[4].mxu0 %v62_v34  ;;  %354 = vmatmul.mubr.f32.gmra.mrb[4].mxu1 %v70_v35 }
  0x2d   :  { %344 = vmatprep.mubr.f32.mxu0 %v63_v36  ;;  %356 = vmatprep.mubr.f32.mxu1 %v71_v37 }
  0x30   :  { %345 = vmatmul.mubr.f32.gmra.mrb[6].mxu0 %v64_v38  ;;  %357 = vmatmul.mubr.f32.gmra.mrb[6].mxu1 %v72_v39 }
  0xf7   :  { %v337_v41 = vpop.f32.mrb[0].mxu0  ;;  %v349_v42 = vpop.f32.mrb[0].mxu1 }
  0xf8   :  { %v235_v43 = vadd.f32 %v337_v41, %v270_v40  ;;  %v243_v44 = vadd.f32 %v349_v42, %v270_v40  ;;  %v155_v45 = vpop.f32.mrb[1].mxu0  ;;  %v195_v46 = vpop.f32.mrb[1].mxu1 }
  0xf9   :  { %v234_v47 = vadd.f32 %v270_v40, %v155_v45  ;;  %v242_v48 = vadd.f32 %v270_v40, %v195_v46 }
  0xfa   :  { %251 = vst [vmem:[%s577_s3 + $0x8] sm:$0xff] %v235_v43  ;;  %259 = vst [vmem:[%s577_s3 + $0x48] sm:$0xff] %v243_v44 }
  0xfb   :  { %250 = vst [vmem:[%s577_s3] sm:$0xff] %v234_v47  ;;  %258 = vst [vmem:[%s577_s3 + $0x40] sm:$0xff] %v242_v48  ;;  %v340_v49 = vpop.f32.mrb[2].mxu0  ;;  %v352_v50 = vpop.f32.mrb[2].mxu1 }
  0xfc   :  { %v237_v51 = vadd.f32 %v340_v49, %v270_v40  ;;  %v245_v52 = vadd.f32 %v352_v50, %v270_v40  ;;  %v165_v53 = vpop.f32.mrb[3].mxu0  ;;  %v205_v54 = vpop.f32.mrb[3].mxu1 }
  0xfd   :  { %v236_v55 = vadd.f32 %v270_v40, %v165_v53  ;;  %v244_v56 = vadd.f32 %v270_v40, %v205_v54 }
  0xfe   :  { %253 = vst [vmem:[%s577_s3 + $0x18] sm:$0xff] %v237_v51  ;;  %261 = vst [vmem:[%s577_s3 + $0x58] sm:$0xff] %v245_v52 }
  0xff   :  { %252 = vst [vmem:[%s577_s3 + $0x10] sm:$0xff] %v236_v55  ;;  %260 = vst [vmem:[%s577_s3 + $0x50] sm:$0xff] %v244_v56  ;;  %v343_v57 = vpop.f32.mrb[4].mxu0  ;;  %v355_v58 = vpop.f32.mrb[4].mxu1 }
 0x100   :  { %v239_v59 = vadd.f32 %v343_v57, %v270_v40  ;;  %v247_v60 = vadd.f32 %v355_v58, %v270_v40  ;;  %v175_v61 = vpop.f32.mrb[5].mxu0  ;;  %v215_v62 = vpop.f32.mrb[5].mxu1 }
 0x101   :  { %v238_v63 = vadd.f32 %v270_v40, %v175_v61  ;;  %v246_v0 = vadd.f32 %v270_v40, %v215_v62 }
 0x102   :  { %255 = vst [vmem:[%s577_s3 + $0x28] sm:$0xff] %v239_v59  ;;  %263 = vst [vmem:[%s577_s3 + $0x68] sm:$0xff] %v247_v60 }
 0x103   :  { %254 = vst [vmem:[%s577_s3 + $0x20] sm:$0xff] %v238_v63  ;;  %262 = vst [vmem:[%s577_s3 + $0x60] sm:$0xff] %v246_v0  ;;  %v346_v1 = vpop.f32.mrb[6].mxu0  ;;  %v358_v2 = vpop.f32.mrb[6].mxu1 }
 0x104   :  { %v241_v3 = vadd.f32 %v346_v1, %v270_v40  ;;  %v249_v4 = vadd.f32 %v358_v2, %v270_v40  ;;  %v185_v5 = vpop.f32.mrb[7].mxu0  ;;  %v225_v6 = vpop.f32.mrb[7].mxu1 }
 0x105   :  { %v240_v7 = vadd.f32 %v270_v40, %v185_v5  ;;  %v248_v8 = vadd.f32 %v270_v40, %v225_v6 }
 0x106   :  { %257 = vst [vmem:[%s577_s3 + $0x38] sm:$0xff] %v241_v3  ;;  %265 = vst [vmem:[%s577_s3 + $0x78] sm:$0xff] %v249_v4 }
 0x107   :  { %256 = vst [vmem:[%s577_s3 + $0x30] sm:$0xff] %v240_v7  ;;  %264 = vst [vmem:[%s577_s3 + $0x70] sm:$0xff] %v248_v8 }

// kernel: textnet_forward.8
= control target key start
LH: loop header
LB: loop body
LE: loop exit
PB: predicated region body
PF: predicated region fallthrough
CT: control target
= control target key end

     0   :  { %s1131_s9 = smov 0   ;;  %s1133_s10 = smov 0   ;;  %s1528_s0 = inlined_call_operand.vmem [shape: f32[8,16,512], index: 0, kind: input, shape index: {}]   ;;  %s1529_s1 = inlined_call_operand.vmem [shape: f32[128,512], index: 1, kind: input, shape index: {}]   ;;  %s1530_s2 = inlined_call_operand.vmem [shape: f32[8,16,128], index: 2, kind: output, shape index: {}]  }
   0x1   :  { %s1135_s11 = smov 0   ;;  %s1137_s12 = smov 0  }
   0x2   :  { %s1139_s13 = smov 0   ;;  %s1141_s14 = smov 0  }
   0x3   :  { %s1143_s15 = smov 0  }
   0x4 LB: > { %s21_s16 = sadd.s32 1, %s1104_s13  ;;  %s24_s17 = sadd.s32 1, %s1108_s14  ;;  %s1112_s15 = sphi %s1143_s15, %s12_s15   ;;  %s1108_s14 = sphi %s1141_s14, %s1537_s14   ;;  %s1104_s13 = sphi %s1139_s13, %s1536_s13   ;;  %s1100_s12 = sphi %s1137_s12, %s1535_s12   ;;  %s1096_s11 = sphi %s1135_s11, %s1534_s11   ;;  %s1092_s10 = sphi %s1133_s10, %s1533_s10   ;;  %s1088_s9 = sphi %s1131_s9, %s1532_s9  }
   0x5   : > { %p22_p0 = scmp.ge.s32.totalorder %s21_s16, 4  ;;  %s808_s18 = sadd.s32 4294967295, %s1112_s15  }
   0x6   : > { %p40_p1 = scmp.ne.s32.totalorder %s1092_s10, %s1088_s9  ;;  %p41_p2 = scmp.eq.s32.totalorder %s1112_s15, 0 }
   0x7   : > { %s1539_s16 = smov (%p22_p0, %s21_s16), 0  ;;  %s1541_s17 = smov (!%p22_p0, %s24_s17), %s1108_s14 }
   0x8   : > { %p26_p3 = scmp.ge.s32.totalorder %s1541_s17, 2  ;;  %p93_p4 = scmp.eq.s32.totalorder %s808_s18, 7 }
   0x9   : > { %s28_s19 = ssub.s32 %s1104_s13, %s1539_s16  ;;  %p42_p5 = por %p41_p2, %p40_p1 }
   0xa   : > { %s1543_s17 = smov (%p26_p3, %s1541_s17), 0  ;;  %p1179_p6 = por %p93_p4, %p40_p1 }
   0xb   : > { %s29_s21 = ssub.s32 %s1108_s14, %s1543_s17  ;;  %s33_s23 = sadd.s32 1, %s1092_s10 }
   0xc   : > { %s30_s22 = sor.u32 %s29_s21, %s28_s19  ;;  %p811_p8 = scmp.ge.s32.totalorder %s1112_s15, 8 }
   0xd   : > { %p31_p7 = scmp.eq.s32.totalorder %s30_s22, 0 }
   0xe   : > { %118 = sbr.rel (%p811_p8) target bundleno = 32 (0x20), region = 20 }
   0xf   : > { %s1187_s24 = scalar_select %p31_p7, %s1092_s10, %s33_s23  }
  0x15   : > { %121 = sbr.rel (!%p42_p5) target bundleno = 32 (0x20), region = 24  ;;  %s123_s25 = sand.u32 (%p42_p5), 1, %s1092_s10  }
  0x16   : > { %s814_s26 = sshll.u32 (%p42_p5), %s1108_s14, 2  ;;  %s812_s27 = sshll.u32 (%p42_p5), %s123_s25, 6 }
  0x17   : > { %s838_s28 = sshll.u32 (%p42_p5), %s1104_s13, 4  ;;  %s125_s6 = scalar_lea.vmem (%p42_p5), [#allocation4], %s812_s27 }
  0x18   : > { %s129_s29 = sadd.s32 (%p42_p5), %s838_s28, %s814_s26 }
  0x19   : > { %s816_s30 = sshll.u32 (%p42_p5), %s129_s29, 3 }
  0x1a   : > { %s131_s5 = scalar_lea.vmem (%p42_p5), %s1528_s0, %s816_s30 }
  0x1b   : > { %v144_v0 = vld [vmem:[%s131_s5] sm:$0xff] (%p42_p5)  ;;  %v146_v1 = vld [vmem:[%s131_s5 + $0x8] sm:$0xff] (%p42_p5)  ;;  %v148_v2 = vld [vmem:[%s131_s5 + $0x10] sm:$0xff] (%p42_p5) }
  0x1c   : > { %145 = vst [vmem:[%s125_s6] sm:$0xff] %v144_v0  ;;  %147 = vst [vmem:[%s125_s6 + $0x8] sm:$0xff] %v146_v1  ;;  %v150_v3 = vld [vmem:[%s131_s5 + $0x18] sm:$0xff]  ;;  %v152_v4 = vld [vmem:[%s131_s5 + $0x40] sm:$0xff] }
  0x1d   : > { %149 = vst [vmem:[%s125_s6 + $0x10] sm:$0xff] %v148_v2  ;;  %v154_v5 = vld [vmem:[%s131_s5 + $0x48] sm:$0xff]  ;;  %151 = vst [vmem:[%s125_s6 + $0x18] sm:$0xff] %v150_v3  ;;  %v156_v6 = vld [vmem:[%s131_s5 + $0x50] sm:$0xff] }
  0x1e   : > { %153 = vst [vmem:[%s125_s6 + $0x20] sm:$0xff] %v152_v4  ;;  %155 = vst [vmem:[%s125_s6 + $0x28] sm:$0xff] %v154_v5  ;;  %v158_v7 = vld [vmem:[%s131_s5 + $0x58] sm:$0xff] }
  0x1f   : > { %157 = vst [vmem:[%s125_s6 + $0x30] sm:$0xff] %v156_v6  ;;  %159 = vst [vmem:[%s125_s6 + $0x38] sm:$0xff] %v158_v7 }
  0x20 PF: > { %p817_p9 = scmp.ge.s32.totalorder %s1112_s15, 1  ;;  %p164_p10 = scmp.lt.s32.totalorder %s1112_s15, 9 }
  0x22   : > { %p165_p11 = pnand %p817_p9, %p164_p10 }
  0x23   : > { %s171_s7 = sand.u32 (!%p165_p11), 1, %s1088_s9   ;;  %p820_p12 = scmp.ne.s32.totalorder (!%p165_p11), %s1096_s11, 0 }
  0x24   : > { %168 = sbr.rel (%p165_p11) target bundleno = 611 (0x263), region = 47  ;;  %s818_s8 = sshll.u32 (!%p165_p11), %s171_s7, 6 }
  0x25   : > { %s819_s18 = sshll.u32 (!%p165_p11), %s171_s7, 4  ;;  %s1199_s19 = scalar_lea.vmem (!%p165_p11), [#allocation4], %s818_s8 }
  0x26   : > { %s1201_s21 = scalar_lea.vmem (!%p165_p11), [#allocation5], %s819_s18 }
  0x2b   : > { %196 = sbr.rel (%p820_p12) target bundleno = 50 (0x32), region = 55  ;;  %v1114_v8 = vmov (!%p820_p12), 0.0  }
  0x2c   : > { %197 = vst [vmem:[#allocation2] sm:$0xff] (!%p820_p12), %v1114_v8  ;;  %198 = vst [vmem:[#allocation3] sm:$0xff] (!%p820_p12), %v1114_v8 }
  0x32 PF: > { %v206_v9 = vld [vmem:[%s1529_s1 + $0x8] sm:$0xff]  ;;  %v205_v11 = vld [vmem:[%s1529_s1] sm:$0xff]  ;;  %v1115_v16 = vmov 0.0   ;;  %v208_v28 = vld [vmem:[%s1529_s1 + $0x18] sm:$0xff] }
  0x33   : > { %v210_v10 = vld [vmem:[%s1529_s1 + $0x28] sm:$0xff]  ;;  %v209_v13 = vld [vmem:[%s1529_s1 + $0x20] sm:$0xff]  ;;  %333 = vmatprep.mubr.f32.mxu0 %v1115_v16  ;;  %404 = vmatprep.mubr.f32.mxu1 %v1115_v16  ;;  %v212_v29 = vld [vmem:[%s1529_s1 + $0x38] sm:$0xff] }
  0x34   : > { %v1213_v12 = vpack.c.bf16 %v210_v10, %v206_v9  ;;  %v214_v14 = vld [vmem:[%s1529_s1 + $0x48] sm:$0xff]  ;;  %v1226_v17 = vpack.c.bf16 %v209_v13, %v205_v11  ;;  %v213_v19 = vld [vmem:[%s1529_s1 + $0x40] sm:$0xff]  ;;  %v1267_v31 = vpack.c.bf16 %v212_v29, %v208_v28  ;;  %v207_v32 = vld [vmem:[%s1529_s1 + $0x10] sm:$0xff] }
  0x35   : > { %v218_v15 = vld [vmem:[%s1529_s1 + $0x68] sm:$0xff]  ;;  %v217_v20 = vld [vmem:[%s1529_s1 + $0x60] sm:$0xff]  ;;  %v211_v33 = vld [vmem:[%s1529_s1 + $0x30] sm:$0xff] }
  0x36   : > { %v1228_v18 = vpack.c.bf16 %v218_v15, %v214_v14  ;;  %v222_v21 = vld [vmem:[%s1529_s1 + $0x88] sm:$0xff]  ;;  %841 = vmatprep.subr.bf16.mxu0 %v1213_v12  ;;  %v1244_v23 = vpack.c.bf16 %v217_v20, %v213_v19  ;;  %v221_v24 = vld [vmem:[%s1529_s1 + $0x80] sm:$0xff]  ;;  %v1275_v34 = vpack.c.bf16 %v211_v33, %v207_v32  ;;  %873 = vmatprep.subr.bf16.mxu1 %v1267_v31  ;;  %v216_v36 = vld [vmem:[%s1529_s1 + $0x58] sm:$0xff] }
  0x37   : > { %v226_v22 = vld [vmem:[%s1529_s1 + $0xa8] sm:$0xff]  ;;  %843 = vmatpush1.bf16.msra.mxu0 %v1226_v17  ;;  %v225_v25 = vld [vmem:[%s1529_s1 + $0xa0] sm:$0xff]  ;;  %v220_v37 = vld [vmem:[%s1529_s1 + $0x78] sm:$0xff] }
  0x38   : > { %845 = vmatprep.subr.bf16.mxu0 %v1228_v18  ;;  %v1253_v26 = vpack.c.bf16 %v226_v22, %v222_v21  ;;  %v230_v27 = vld [vmem:[%s1529_s1 + $0xc8] sm:$0xff]  ;;  %v1278_v35 = vpack.c.bf16 %v225_v25, %v221_v24  ;;  %v215_v38 = vld [vmem:[%s1529_s1 + $0x50] sm:$0xff]  ;;  %v229_v40 = vld [vmem:[%s1529_s1 + $0xc0] sm:$0xff]  ;;  %875 = vmatpush1.bf16.msra.mxu1 %v1275_v34  ;;  %v1300_v42 = vpack.c.bf16 %v220_v37, %v216_v36 }
  0x39   : > { %v234_v30 = vld [vmem:[%s1529_s1 + $0xe8] sm:$0xff]  ;;  %v233_v41 = vld [vmem:[%s1529_s1 + $0xe0] sm:$0xff]  ;;  %v219_v43 = vld [vmem:[%s1529_s1 + $0x70] sm:$0xff] }
  0x3a   : > { %v1291_v39 = vpack.c.bf16 %v234_v30, %v230_v27  ;;  %v238_v44 = vld [vmem:[%s1529_s1 + $0x108] sm:$0xff]  ;;  %v1311_v46 = vpack.c.bf16 %v219_v43, %v215_v38  ;;  %v224_v47 = vld [vmem:[%s1529_s1 + $0x98] sm:$0xff]  ;;  %877 = vmatprep.subr.bf16.mxu1 %v1300_v42  ;;  %v223_v49 = vld [vmem:[%s1529_s1 + $0x90] sm:$0xff]  ;;  %v1327_v51 = vpack.c.bf16 %v233_v41, %v229_v40 }
  0x3b   : > { %847 = vmatpush1.bf16.msra.mxu0 %v1244_v23  ;;  %v242_v45 = vld [vmem:[%s1529_s1 + $0x128] sm:$0xff]  ;;  %v228_v48 = vld [vmem:[%s1529_s1 + $0xb8] sm:$0xff]  ;;  %v227_v50 = vld [vmem:[%s1529_s1 + $0xb0] sm:$0xff] }
  0x3c   : > { %849 = vmatprep.subr.bf16.mxu0 %v1253_v26  ;;  %v237_v52 = vld [vmem:[%s1529_s1 + $0x100] sm:$0xff]  ;;  %v1335_v54 = vpack.c.bf16 %v228_v48, %v224_v47  ;;  %v1338_v55 = vpack.c.bf16 %v242_v45, %v238_v44  ;;  %879 = vmatpush1.bf16.msra.mxu1 %v1311_v46  ;;  %v246_v56 = vld [vmem:[%s1529_s1 + $0x148] sm:$0xff]  ;;  %v1344_v57 = vpack.c.bf16 %v227_v50, %v223_v49  ;;  %v232_v58 = vld [vmem:[%s1529_s1 + $0xd8] sm:$0xff] }
  0x3d   : > { %v241_v53 = vld [vmem:[%s1529_s1 + $0x120] sm:$0xff]  ;;  %v236_v59 = vld [vmem:[%s1529_s1 + $0xf8] sm:$0xff]  ;;  %v250_v60 = vld [vmem:[%s1529_s1 + $0x168] sm:$0xff] }
  0x3e   : > { %881 = vmatprep.subr.bf16.mxu1 %v1335_v54  ;;  %v1356_v61 = vpack.c.bf16 %v236_v59, %v232_v58  ;;  %v231_v62 = vld [vmem:[%s1529_s1 + $0xd0] sm:$0xff]  ;;  %v1365_v0 = vpack.c.bf16 %v241_v53, %v237_v52  ;;  %v240_v1 = vld [vmem:[%s1529_s1 + $0x118] sm:$0xff]  ;;  %v1374_v3 = vpack.c.bf16 %v250_v60, %v246_v56  ;;  %v245_v4 = vld [vmem:[%s1529_s1 + $0x140] sm:$0xff] }
  0x3f   : > { %851 = vmatpush1.bf16.msra.mxu0 %v1278_v35  ;;  %v235_v63 = vld [vmem:[%s1529_s1 + $0xf0] sm:$0xff]  ;;  %v244_v2 = vld [vmem:[%s1529_s1 + $0x138] sm:$0xff]  ;;  %v249_v5 = vld [vmem:[%s1529_s1 + $0x160] sm:$0xff] }
  0x40   : > { %853 = vmatprep.subr.bf16.mxu0 %v1291_v39  ;;  %883 = vmatpush1.bf16.msra.mxu1 %v1344_v57  ;;  %v254_v6 = vld [vmem:[%s1529_s1 + $0x188] sm:$0xff]  ;;  %v1386_v7 = vpack.c.bf16 %v235_v63, %v231_v62  ;;  %v1392_v9 = vpack.c.bf16 %v244_v2, %v240_v1  ;;  %v239_v10 = vld [vmem:[%s1529_s1 + $0x110] sm:$0xff]  ;;  %v248_v13 = vld [vmem:[%s1529_s1 + $0x158] sm:$0xff]  ;;  %v1407_v15 = vpack.c.bf16 %v249_v5, %v245_v4 }
  0x41   : > { %v258_v8 = vld [vmem:[%s1529_s1 + $0x1a8] sm:$0xff]  ;;  %885 = vmatprep.subr.bf16.mxu1 %v1356_v61  ;;  %v243_v11 = vld [vmem:[%s1529_s1 + $0x130] sm:$0xff]  ;;  %v252_v14 = vld [vmem:[%s1529_s1 + $0x178] sm:$0xff] }
  0x42   : > { %v1410_v19 = vpack.c.bf16 %v258_v8, %v254_v6  ;;  %v253_v20 = vld [vmem:[%s1529_s1 + $0x180] sm:$0xff]  ;;  %v262_v22 = vld [vmem:[%s1529_s1 + $0x1c8] sm:$0xff]  ;;  %v890_v24 = vpack.c.bf16 %v243_v11, %v239_v10  ;;  %v892_v27 = vpack.c.bf16 %v252_v14, %v248_v13  ;;  %v247_v28 = vld [vmem:[%s1529_s1 + $0x150] sm:$0xff] }
  0x43   : > { %855 = vmatpush1.bf16.msra.mxu0 %v1327_v51  ;;  %v257_v21 = vld [vmem:[%s1529_s1 + $0x1a0] sm:$0xff]  ;;  %v266_v25 = vld [vmem:[%s1529_s1 + $0x1e8] sm:$0xff]  ;;  %v251_v29 = vld [vmem:[%s1529_s1 + $0x170] sm:$0xff] }
  0x44   : > { %857 = vmatprep.subr.bf16.mxu0 %v1338_v55  ;;  %887 = vmatpush1.bf16.msra.mxu1 %v1386_v7  ;;  %v256_v30 = vld [vmem:[%s1529_s1 + $0x198] sm:$0xff]  ;;  %v866_v33 = vpack.c.bf16 %v257_v21, %v253_v20  ;;  %v868_v36 = vpack.c.bf16 %v266_v25, %v262_v22  ;;  %v261_v37 = vld [vmem:[%s1529_s1 + $0x1c0] sm:$0xff]  ;;  %v894_v40 = vpack.c.bf16 %v251_v29, %v247_v28  ;;  %v255_v43 = vld [vmem:[%s1529_s1 + $0x190] sm:$0xff] }
  0x45   : > { %889 = vmatprep.subr.bf16.mxu1 %v1392_v9  ;;  %v260_v32 = vld [vmem:[%s1529_s1 + $0x1b8] sm:$0xff]  ;;  %v265_v38 = vld [vmem:[%s1529_s1 + $0x1e0] sm:$0xff]  ;;  %v259_v44 = vld [vmem:[%s1529_s1 + $0x1b0] sm:$0xff] }
  0x46   : > { %v896_v41 = vpack.c.bf16 %v260_v32, %v256_v30  ;;  %v264_v45 = vld [vmem:[%s1529_s1 + $0x1d8] sm:$0xff]  ;;  %v870_v48 = vpack.c.bf16 %v265_v38, %v261_v37  ;;  %v898_v49 = vpack.c.bf16 %v259_v44, %v255_v43  ;;  %v263_v52 = vld [vmem:[%s1529_s1 + $0x1d0] sm:$0xff]  ;;  %v199_v56 = vld [vmem:[#allocation2] sm:$0xff] }
  0x47   : > { %859 = vmatpush1.bf16.msra.mxu0 %v1365_v0  ;;  %v268_v47 = vld [vmem:[%s1529_s1 + $0x1f8] sm:$0xff]  ;;  %v267_v53 = vld [vmem:[%s1529_s1 + $0x1f0] sm:$0xff]  ;;  %v827_v25 = vld [vmem:[%s1199_s19 + $0x38] sm:$0xff] }
  0x48   : > { %861 = vmatprep.subr.bf16.mxu0 %v1374_v3  ;;  %891 = vmatpush1.bf16.msra.mxu1 %v890_v24  ;;  %v900_v50 = vpack.c.bf16 %v268_v47, %v264_v45  ;;  %v902_v58 = vpack.c.bf16 %v267_v53, %v263_v52  ;;  %v824_v10 = vld [vmem:[%s1199_s19 + $0x20] sm:$0xff]  ;;  %v825_v11 = vld [vmem:[%s1199_s19 + $0x28] sm:$0xff]  ;;  %v826_v28 = vld [vmem:[%s1199_s19 + $0x30] sm:$0xff] }
  0x49   : > { %893 = vmatprep.subr.bf16.mxu1 %v892_v27 }
  0x4b   : > { %863 = vmatpush1.bf16.msra.mxu0 %v1407_v15 }
  0x4c   : > { %865 = vmatprep.subr.bf16.mxu0 %v1410_v19  ;;  %895 = vmatpush1.bf16.msra.mxu1 %v894_v40 }
  0x4d   : > { %897 = vmatprep.subr.bf16.mxu1 %v896_v41 }
  0x4f   : > { %867 = vmatpush1.bf16.msra.mxu0 %v866_v33 }
  0x50   : > { %869 = vmatprep.subr.bf16.mxu0 %v868_v36  ;;  %899 = vmatpush1.bf16.msra.mxu1 %v898_v49 }
  0x51   : > { %901 = vmatprep.subr.bf16.mxu1 %v900_v50 }
  0x53   : > { %871 = vmatpush1.bf16.msra.mxu0 %v870_v48 }
  0x54   : > { %905 = vmatprep.subr.bf16.mxu0 %v1213_v12  ;;  %903 = vmatpush1.bf16.msra.mxu1 %v902_v58  ;;  %v201_v12 = vld [vmem:[%s1199_s19] sm:$0xff] }
  0x55   : > { %937 = vmatprep.subr.bf16.mxu1 %v1267_v31 }
  0x56   : > { %334 = vmatmul.mubr.f32.vlgmr.msra.gmra.mrb[0].mxu0 %v199_v56 }
  0x57   : > { %907 = vmatpush1.bf16.msra.mxu0 %v1226_v17  ;;  %577 = vmatprep.mubr.f32.mxu0 %v1115_v16 }
  0x58   : > { %909 = vmatprep.subr.bf16.mxu0 %v1228_v18  ;;  %405 = vmatmul.mubr.f32.vlgmr.msra.gmra.mrb[0].mxu1 %v199_v56 }
  0x59   : > { %939 = vmatpush1.bf16.msra.mxu1 %v1275_v34  ;;  %648 = vmatprep.mubr.f32.mxu1 %v1115_v16  ;;  %v202_v16 = vld [vmem:[%s1199_s19 + $0x8] sm:$0xff] }
  0x5a   : > { %941 = vmatprep.subr.bf16.mxu1 %v1300_v42 }
  0x5b   : > { %911 = vmatpush1.bf16.msra.mxu0 %v1244_v23 }
  0x5c   : > { %913 = vmatprep.subr.bf16.mxu0 %v1253_v26 }
  0x5d   : > { %943 = vmatpush1.bf16.msra.mxu1 %v1311_v46 }
  0x5e   : > { %945 = vmatprep.subr.bf16.mxu1 %v1335_v54 }
  0x5f   : > { %915 = vmatpush1.bf16.msra.mxu0 %v1278_v35  ;;  %v204_v35 = vld [vmem:[%s1199_s19 + $0x18] sm:$0xff] }
  0x60   : > { %917 = vmatprep.subr.bf16.mxu0 %v1291_v39 }
  0x61   : > { %947 = vmatpush1.bf16.msra.mxu1 %v1344_v57 }
  0x62   : > { %949 = vmatprep.subr.bf16.mxu1 %v1356_v61 }
  0x63   : > { %919 = vmatpush1.bf16.msra.mxu0 %v1327_v51  ;;  %v203_v51 = vld [vmem:[%s1199_s19 + $0x10] sm:$0xff]  ;;  %s839_s19 = sshll.u32 (%p1179_p6), %s1096_s11, 2 }
  0x64   : > { %921 = vmatprep.subr.bf16.mxu0 %v1338_v55  ;;  %s696_s22 = sadd.s32 (%p1179_p6), %s1100_s12, %s839_s19 }
  0x65   : > { %951 = vmatpush1.bf16.msra.mxu1 %v1386_v7  ;;  %s835_s23 = sshll.u32 (%p1179_p6), %s696_s22, 3 }
  0x66   : > { %953 = vmatprep.subr.bf16.mxu1 %v1392_v9  ;;  %s698_s9 = scalar_lea.vmem (%p1179_p6), %s1530_s2, %s835_s23 }
  0x67   : > { %923 = vmatpush1.bf16.msra.mxu0 %v1365_v0  ;;  %v200_v0 = vld [vmem:[#allocation3] sm:$0xff] }
  0x68   : > { %925 = vmatprep.subr.bf16.mxu0 %v1374_v3 }
  0x69   : > { %955 = vmatpush1.bf16.msra.mxu1 %v890_v24 }
  0x6a   : > { %957 = vmatprep.subr.bf16.mxu1 %v892_v27 }
  0x6b   : > { %927 = vmatpush1.bf16.msra.mxu0 %v1407_v15 }
  0x6c   : > { %929 = vmatprep.subr.bf16.mxu0 %v1410_v19 }
  0x6d   : > { %959 = vmatpush1.bf16.msra.mxu1 %v894_v40 }
  0x6e   : > { %961 = vmatprep.subr.bf16.mxu1 %v896_v41 }
  0x6f   : > { %931 = vmatpush1.bf16.msra.mxu0 %v866_v33 }
  0x70   : > { %933 = vmatprep.subr.bf16.mxu0 %v868_v36 }
  0x71   : > { %963 = vmatpush1.bf16.msra.mxu1 %v898_v49 }
  0x72   : > { %965 = vmatprep.subr.bf16.mxu1 %v900_v50 }
  0x73   : > { %935 = vmatpush1.bf16.msra.mxu0 %v870_v48 }
  0x75   : > { %967 = vmatpush1.bf16.msra.mxu1 %v902_v58 }
 0x129   : > { %v335_v17 = vpop.f32.mrb[0].mxu0 }
 0x12a   : > { %v411_v18 = vadd.f32 %v335_v17, %v201_v12  ;;  %v337_v23 = vpop.f32.mrb[1].mxu0 }
 0x12b   : > { %v412_v26 = vadd.f32 %v337_v23, %v202_v16  ;;  %v406_v39 = vpop.f32.mrb[0].mxu1 }
 0x12c   : > { %v821_v31 = vmul.f32 -1.442695, %v411_v18  ;;  %v408_v42 = vpop.f32.mrb[1].mxu1  ;;  %v413_v55 = vadd.f32 %v406_v39, %v203_v51 }
 0x12d   : > { %v822_v34 = vmul.f32 -1.442695, %v412_v26  ;;  %v414_v46 = vadd.f32 %v408_v42, %v204_v35 }
 0x12e   : > { %1026 = vpow2.f32 %v821_v31 }
 0x12f   : > { %1028 = vpow2.f32 %v822_v34  ;;  %v823_v54 = vmul.f32 -1.442695, %v414_v46 }
 0x131   : > { %1030 = vpow2.f32 %v823_v54 }
 0x132   : > { %1032 = vtanh.f32 %v413_v55 }
 0x138   : > { %v1027_v57 = vpop.eup %1026 }
 0x139   : > { %v1029_v59 = vpop.eup %1028  ;;  %v418_v60 = vadd.f32 1.0, %v1027_v57 }
 0x13a   : > { %v424_v61 = vadd.f32 1.0, %v1029_v59 }
 0x13b   : > { %1034 = vrcp.f32 %v418_v60  ;;  %v1031_v62 = vpop.eup %1030 }
 0x13c   : > { %1036 = vrcp.f32 %v424_v61  ;;  %v1033_v63 = vpop.eup %1032  ;;  %v431_v2 = vadd.f32 1.0, %v1031_v62 }
 0x13e   : > { %1038 = vrcp.f32 %v431_v2 }
 0x145   : > { %v1035_v1 = vpop.eup %1034 }
 0x146   : > { %v1037_v3 = vpop.eup %1036  ;;  %v435_v4 = vmul.f32 %v1035_v1, %v1033_v63 }
 0x147   : > { %v434_v5 = vmul.f32 %v1037_v3, %v200_v0 }
 0x148   : > { %v1039_v7 = vpop.eup %1038 }
 0x149   : > { %v436_v6 = vadd.f32 %v435_v4, %v434_v5 }
 0x14b   : > { %1040 = vtanh.f32 %v436_v6 }
 0x155   : > { %v1041_v8 = vpop.eup %1040 }
 0x156   : > { %v438_v9 = vmul.f32 %v1041_v8, %v1039_v7 }
 0x158   : > { %441 = vst [vmem:[%s1201_s21] sm:$0xff] %v438_v9  ;;  %578 = vmatmul.mubr.f32.vlgmr.msra.gmra.mrb[2].mxu0 %v438_v9  ;;  %649 = vmatmul.mubr.f32.vlgmr.msra.gmra.mrb[2].mxu1 %v438_v9 }
 0x15f   : > { %v728_v53 = vld [vmem:[%s1201_s21] sm:$0xff] (%p1179_p6) }
 0x160   : > { %729 = vst [vmem:[%s698_s9] sm:$0xff] (%p1179_p6), %v728_v53 }
 0x22b   : > { %v579_v13 = vpop.f32.mrb[2].mxu0  ;;  %v650_v14 = vpop.f32.mrb[2].mxu1 }
 0x22c   : > { %v655_v15 = vadd.f32 %v824_v10, %v579_v13  ;;  %v581_v19 = vpop.f32.mrb[3].mxu0  ;;  %v652_v20 = vpop.f32.mrb[3].mxu1  ;;  %v657_v30 = vadd.f32 %v826_v28, %v650_v14 }
 0x22d   : > { %v656_v21 = vadd.f32 %v825_v11, %v581_v19  ;;  %v658_v27 = vadd.f32 %v827_v25, %v652_v20 }
 0x22e   : > { %v828_v22 = vmul.f32 -1.442695, %v655_v15 }
 0x22f   : > { %v829_v24 = vmul.f32 -1.442695, %v656_v21  ;;  %v830_v29 = vmul.f32 -1.442695, %v658_v27 }
 0x230   : > { %1042 = vpow2.f32 %v828_v22 }
 0x231   : > { %1044 = vpow2.f32 %v829_v24 }
 0x232   : > { %1046 = vpow2.f32 %v830_v29 }
 0x233   : > { %1048 = vtanh.f32 %v657_v30 }
 0x23a   : > { %v1043_v32 = vpop.eup %1042 }
 0x23b   : > { %v1045_v33 = vpop.eup %1044  ;;  %v662_v36 = vadd.f32 1.0, %v1043_v32 }
 0x23c   : > { %v668_v37 = vadd.f32 1.0, %v1045_v33  ;;  %v1047_v38 = vpop.eup %1046 }
 0x23d   : > { %1050 = vrcp.f32 %v662_v36  ;;  %v1049_v40 = vpop.eup %1048  ;;  %v675_v45 = vadd.f32 1.0, %v1047_v38 }
 0x23e   : > { %1052 = vrcp.f32 %v668_v37 }
 0x23f   : > { %1054 = vrcp.f32 %v675_v45 }
 0x247   : > { %v1051_v41 = vpop.eup %1050 }
 0x248   : > { %v1053_v43 = vpop.eup %1052  ;;  %v679_v44 = vmul.f32 %v1051_v41, %v1049_v40 }
 0x249   : > { %v678_v47 = vmul.f32 %v1053_v43, %v436_v6  ;;  %v1055_v49 = vpop.eup %1054 }
 0x24b   : > { %v680_v48 = vadd.f32 %v679_v44, %v678_v47 }
 0x24d   : > { %1056 = vtanh.f32 %v680_v48  ;;  %683 = vst [vmem:[#allocation3] sm:$0xff] %v680_v48 }
 0x254   : > { %693 = sbr.rel (!%p1179_p6) target bundleno = 611 (0x263), region = 59 }
 0x257   : > { %v1057_v50 = vpop.eup %1056 }
 0x258   : > { %v682_v52 = vmul.f32 %v1057_v50, %v1055_v49 }
 0x25a   : > { %684 = vst [vmem:[#allocation2] sm:$0xff] %v682_v52  ;;  %831 = vst [vmem:[%s1201_s21 + $0x8] sm:$0xff] %v682_v52 }
 0x261   : > { %v730_v56 = vld [vmem:[%s1201_s21 + $0x8] sm:$0xff] }
 0x262   : > { %731 = vst [vmem:[%s698_s9 + $0x10] sm:$0xff] %v730_v56 }
 0x263 PF: > { %s12_s15 = sadd.s32 1, %s1112_s15   ;;  %s1532_s9 = smov %s1092_s10 }
 0x264   : > { %p9_p13 = scmp.ge.s32.totalorder %s12_s15, 10   ;;  %s1533_s10 = smov %s1187_s24 }
 0x265   : > { %s1534_s11 = smov %s1104_s13  ;;  %s1535_s12 = smov %s1108_s14 }
 0x266   : > { %s1536_s13 = smov %s1539_s16  ;;  %s1537_s14 = smov %s1543_s17 }
 0x267   :  { %11 = sbr.rel (!%p9_p13) target bundleno = 4 (0x4), region = 130 }

// kernel: textnet_forward.7
= control target key start
LH: loop header
LB: loop body
LE: loop exit
PB: predicated region body
PF: predicated region fallthrough
CT: control target
= control target key end

     0   :  { %v767_v3 = vmov 0.0   ;;  %s1327_s1 = inlined_call_operand.vmem [shape: f32[128,512], index: 1, kind: input, shape index: {}]   ;;  %s1328_s0 = inlined_call_operand.vmem [shape: f32[128,128], index: 0, kind: input, shape index: {}]   ;;  %s1329_s2 = inlined_call_operand.vmem [shape: f32[1,512], index: 2, kind: input, shape index: {}]   ;;  %s1330_s3 = inlined_call_operand.vmem [shape: f32[128,512], index: 3, kind: output, shape index: {}]  }
   0x1   :  { %v185_v0 = vld [vmem:[%s1327_s1 + $0x8] sm:$0xff]  ;;  %v187_v2 = vld [vmem:[%s1327_s1 + $0x18] sm:$0xff]  ;;  %312 = vmatprep.mubr.f32.mxu0 %v767_v3  ;;  %473 = vmatprep.mubr.f32.mxu1 %v767_v3  ;;  %v184_v6 = vld [vmem:[%s1327_s1] sm:$0xff] }
   0x2   :  { %v189_v1 = vld [vmem:[%s1327_s1 + $0x28] sm:$0xff]  ;;  %v191_v5 = vld [vmem:[%s1327_s1 + $0x38] sm:$0xff]  ;;  %v188_v7 = vld [vmem:[%s1327_s1 + $0x20] sm:$0xff] }
   0x3   :  { %v702_v4 = vpack.c.bf16 %v189_v1, %v185_v0  ;;  %v734_v8 = vpack.c.bf16 %v191_v5, %v187_v2  ;;  %v704_v9 = vpack.c.bf16 %v188_v7, %v184_v6  ;;  %v186_v10 = vld [vmem:[%s1327_s1 + $0x10] sm:$0xff]  ;;  %v193_v12 = vld [vmem:[%s1327_s1 + $0x48] sm:$0xff]  ;;  %v195_v15 = vld [vmem:[%s1327_s1 + $0x58] sm:$0xff] }
   0x4   :  { %v190_v11 = vld [vmem:[%s1327_s1 + $0x30] sm:$0xff]  ;;  %v197_v14 = vld [vmem:[%s1327_s1 + $0x68] sm:$0xff]  ;;  %v199_v16 = vld [vmem:[%s1327_s1 + $0x78] sm:$0xff] }
   0x5   :  { %703 = vmatprep.subr.bf16.mxu0 %v702_v4  ;;  %v736_v13 = vpack.c.bf16 %v190_v11, %v186_v10  ;;  %735 = vmatprep.subr.bf16.mxu1 %v734_v8  ;;  %v706_v17 = vpack.c.bf16 %v197_v14, %v193_v12  ;;  %v738_v18 = vpack.c.bf16 %v199_v16, %v195_v15  ;;  %v192_v19 = vld [vmem:[%s1327_s1 + $0x40] sm:$0xff]  ;;  %v194_v21 = vld [vmem:[%s1327_s1 + $0x50] sm:$0xff]  ;;  %v201_v24 = vld [vmem:[%s1327_s1 + $0x88] sm:$0xff] }
   0x6   :  { %705 = vmatpush1.bf16.msra.mxu0 %v704_v9  ;;  %v196_v20 = vld [vmem:[%s1327_s1 + $0x60] sm:$0xff]  ;;  %v198_v23 = vld [vmem:[%s1327_s1 + $0x70] sm:$0xff]  ;;  %v205_v25 = vld [vmem:[%s1327_s1 + $0xa8] sm:$0xff] }
   0x7   :  { %737 = vmatpush1.bf16.msra.mxu1 %v736_v13  ;;  %v708_v22 = vpack.c.bf16 %v196_v20, %v192_v19  ;;  %707 = vmatprep.subr.bf16.mxu0 %v706_v17  ;;  %v740_v26 = vpack.c.bf16 %v198_v23, %v194_v21  ;;  %v710_v27 = vpack.c.bf16 %v205_v25, %v201_v24  ;;  %v203_v28 = vld [vmem:[%s1327_s1 + $0x98] sm:$0xff]  ;;  %v200_v30 = vld [vmem:[%s1327_s1 + $0x80] sm:$0xff]  ;;  %v202_v33 = vld [vmem:[%s1327_s1 + $0x90] sm:$0xff] }
   0x8   :  { %739 = vmatprep.subr.bf16.mxu1 %v738_v18  ;;  %v207_v29 = vld [vmem:[%s1327_s1 + $0xb8] sm:$0xff]  ;;  %v204_v32 = vld [vmem:[%s1327_s1 + $0xa0] sm:$0xff]  ;;  %v206_v34 = vld [vmem:[%s1327_s1 + $0xb0] sm:$0xff] }
   0x9   :  { %v742_v31 = vpack.c.bf16 %v207_v29, %v203_v28  ;;  %v712_v35 = vpack.c.bf16 %v204_v32, %v200_v30  ;;  %v209_v36 = vld [vmem:[%s1327_s1 + $0xc8] sm:$0xff]  ;;  %v211_v38 = vld [vmem:[%s1327_s1 + $0xd8] sm:$0xff]  ;;  %v744_v39 = vpack.c.bf16 %v206_v34, %v202_v33  ;;  %v208_v42 = vld [vmem:[%s1327_s1 + $0xc0] sm:$0xff] }
   0xa   :  { %709 = vmatpush1.bf16.msra.mxu0 %v708_v22  ;;  %v213_v37 = vld [vmem:[%s1327_s1 + $0xe8] sm:$0xff]  ;;  %v215_v41 = vld [vmem:[%s1327_s1 + $0xf8] sm:$0xff]  ;;  %v212_v43 = vld [vmem:[%s1327_s1 + $0xe0] sm:$0xff] }
   0xb   :  { %741 = vmatpush1.bf16.msra.mxu1 %v740_v26  ;;  %711 = vmatprep.subr.bf16.mxu0 %v710_v27  ;;  %v714_v40 = vpack.c.bf16 %v213_v37, %v209_v36  ;;  %v746_v44 = vpack.c.bf16 %v215_v41, %v211_v38  ;;  %v210_v45 = vld [vmem:[%s1327_s1 + $0xd0] sm:$0xff]  ;;  %v217_v47 = vld [vmem:[%s1327_s1 + $0x108] sm:$0xff]  ;;  %v219_v49 = vld [vmem:[%s1327_s1 + $0x118] sm:$0xff]  ;;  %v716_v51 = vpack.c.bf16 %v212_v43, %v208_v42 }
   0xc   :  { %743 = vmatprep.subr.bf16.mxu1 %v742_v31  ;;  %v214_v46 = vld [vmem:[%s1327_s1 + $0xf0] sm:$0xff]  ;;  %v221_v48 = vld [vmem:[%s1327_s1 + $0x128] sm:$0xff]  ;;  %v223_v50 = vld [vmem:[%s1327_s1 + $0x138] sm:$0xff] }
   0xd   :  { %v748_v52 = vpack.c.bf16 %v214_v46, %v210_v45  ;;  %v718_v53 = vpack.c.bf16 %v221_v48, %v217_v47  ;;  %v216_v54 = vld [vmem:[%s1327_s1 + $0x100] sm:$0xff]  ;;  %v218_v56 = vld [vmem:[%s1327_s1 + $0x110] sm:$0xff]  ;;  %v750_v57 = vpack.c.bf16 %v223_v50, %v219_v49  ;;  %v225_v59 = vld [vmem:[%s1327_s1 + $0x148] sm:$0xff]  ;;  %v20_v50 = vlaneseq }
   0xe   :  { %713 = vmatpush1.bf16.msra.mxu0 %v712_v35  ;;  %v220_v55 = vld [vmem:[%s1327_s1 + $0x120] sm:$0xff]  ;;  %v222_v58 = vld [vmem:[%s1327_s1 + $0x130] sm:$0xff]  ;;  %v229_v60 = vld [vmem:[%s1327_s1 + $0x168] sm:$0xff] }
   0xf   :  { %745 = vmatpush1.bf16.msra.mxu1 %v744_v39  ;;  %715 = vmatprep.subr.bf16.mxu0 %v714_v40  ;;  %v227_v61 = vld [vmem:[%s1327_s1 + $0x158] sm:$0xff]  ;;  %v720_v63 = vpack.c.bf16 %v220_v55, %v216_v54  ;;  %v752_v0 = vpack.c.bf16 %v222_v58, %v218_v56  ;;  %v722_v1 = vpack.c.bf16 %v229_v60, %v225_v59  ;;  %v224_v2 = vld [vmem:[%s1327_s1 + $0x140] sm:$0xff]  ;;  %v226_v5 = vld [vmem:[%s1327_s1 + $0x150] sm:$0xff] }
  0x10   :  { %747 = vmatprep.subr.bf16.mxu1 %v746_v44  ;;  %v231_v62 = vld [vmem:[%s1327_s1 + $0x178] sm:$0xff]  ;;  %v228_v4 = vld [vmem:[%s1327_s1 + $0x160] sm:$0xff]  ;;  %v230_v7 = vld [vmem:[%s1327_s1 + $0x170] sm:$0xff] }
  0x11   :  { %v754_v6 = vpack.c.bf16 %v231_v62, %v227_v61  ;;  %v233_v8 = vld [vmem:[%s1327_s1 + $0x188] sm:$0xff]  ;;  %v235_v10 = vld [vmem:[%s1327_s1 + $0x198] sm:$0xff]  ;;  %v724_v12 = vpack.c.bf16 %v228_v4, %v224_v2  ;;  %v756_v13 = vpack.c.bf16 %v230_v7, %v226_v5  ;;  %v232_v15 = vld [vmem:[%s1327_s1 + $0x180] sm:$0xff] }
  0x12   :  { %717 = vmatpush1.bf16.msra.mxu0 %v716_v51  ;;  %v237_v9 = vld [vmem:[%s1327_s1 + $0x1a8] sm:$0xff]  ;;  %v239_v11 = vld [vmem:[%s1327_s1 + $0x1b8] sm:$0xff]  ;;  %v236_v16 = vld [vmem:[%s1327_s1 + $0x1a0] sm:$0xff]  ;;  %v21_v51 = vshrl.u32 %v20_v50, 7 }
  0x13   :  { %749 = vmatpush1.bf16.msra.mxu1 %v748_v52  ;;  %719 = vmatprep.subr.bf16.mxu0 %v718_v53  ;;  %v726_v14 = vpack.c.bf16 %v237_v9, %v233_v8  ;;  %v234_v17 = vld [vmem:[%s1327_s1 + $0x190] sm:$0xff]  ;;  %v758_v18 = vpack.c.bf16 %v239_v11, %v235_v10  ;;  %v241_v20 = vld [vmem:[%s1327_s1 + $0x1c8] sm:$0xff]  ;;  %v243_v22 = vld [vmem:[%s1327_s1 + $0x1d8] sm:$0xff]  ;;  %v728_v24 = vpack.c.bf16 %v236_v16, %v232_v15 }
  0x14   :  { %751 = vmatprep.subr.bf16.mxu1 %v750_v57  ;;  %v238_v19 = vld [vmem:[%s1327_s1 + $0x1b0] sm:$0xff]  ;;  %v245_v21 = vld [vmem:[%s1327_s1 + $0x1e8] sm:$0xff]  ;;  %v247_v23 = vld [vmem:[%s1327_s1 + $0x1f8] sm:$0xff]  ;;  %v22_v52 = vsub.s32 0, %v21_v51  ;;  %v30_v54 = vsub.s32 2, %v21_v51  ;;  %v26_v55 = vsub.s32 1, %v21_v51 }
  0x15   :  { %v760_v25 = vpack.c.bf16 %v238_v19, %v234_v17  ;;  %v730_v26 = vpack.c.bf16 %v245_v21, %v241_v20  ;;  %v240_v27 = vld [vmem:[%s1327_s1 + $0x1c0] sm:$0xff]  ;;  %v762_v29 = vpack.c.bf16 %v247_v23, %v243_v22  ;;  %v242_v30 = vld [vmem:[%s1327_s1 + $0x1d0] sm:$0xff]  ;;  %v169_v35 = vld [vmem:[%s1328_s0 + $0x8] sm:$0xff]  ;;  %v34_v56 = vsub.s32 3, %v21_v51 }
  0x16   :  { %721 = vmatpush1.bf16.msra.mxu0 %v720_v63  ;;  %v244_v28 = vld [vmem:[%s1327_s1 + $0x1e0] sm:$0xff]  ;;  %v246_v31 = vld [vmem:[%s1327_s1 + $0x1f0] sm:$0xff]  ;;  %v171_v37 = vld [vmem:[%s1328_s0 + $0x18] sm:$0xff] }
  0x17   :  { %753 = vmatpush1.bf16.msra.mxu1 %v752_v0  ;;  %723 = vmatprep.subr.bf16.mxu0 %v722_v1  ;;  %v732_v32 = vpack.c.bf16 %v244_v28, %v240_v27  ;;  %v764_v33 = vpack.c.bf16 %v246_v31, %v242_v30  ;;  %v168_v34 = vld [vmem:[%s1328_s0] sm:$0xff]  ;;  %v170_v36 = vld [vmem:[%s1328_s0 + $0x10] sm:$0xff]  ;;  %v173_v39 = vld [vmem:[%s1328_s0 + $0x28] sm:$0xff] }
  0x18   :  { %755 = vmatprep.subr.bf16.mxu1 %v754_v6  ;;  %v172_v38 = vld [vmem:[%s1328_s0 + $0x20] sm:$0xff]  ;;  %v174_v40 = vld [vmem:[%s1328_s0 + $0x30] sm:$0xff]  ;;  %v175_v41 = vld [vmem:[%s1328_s0 + $0x38] sm:$0xff] }
  0x19   :  { %v176_v42 = vld [vmem:[%s1328_s0 + $0x40] sm:$0xff]  ;;  %v177_v43 = vld [vmem:[%s1328_s0 + $0x48] sm:$0xff]  ;;  %v178_v44 = vld [vmem:[%s1328_s0 + $0x50] sm:$0xff] }
  0x1a   :  { %725 = vmatpush1.bf16.msra.mxu0 %v724_v12  ;;  %v179_v45 = vld [vmem:[%s1328_s0 + $0x58] sm:$0xff]  ;;  %v180_v46 = vld [vmem:[%s1328_s0 + $0x60] sm:$0xff]  ;;  %v181_v47 = vld [vmem:[%s1328_s0 + $0x68] sm:$0xff] }
  0x1b   :  { %757 = vmatpush1.bf16.msra.mxu1 %v756_v13  ;;  %727 = vmatprep.subr.bf16.mxu0 %v726_v14  ;;  %v182_v48 = vld [vmem:[%s1328_s0 + $0x70] sm:$0xff]  ;;  %v183_v49 = vld [vmem:[%s1328_s0 + $0x78] sm:$0xff]  ;;  %v18_v53 = vld [vmem:[%s1329_s2] sm:$0xf] }
  0x1c   :  { %759 = vmatprep.subr.bf16.mxu1 %v758_v18  ;;  %v1063_v57 = vrot.slane %v18_v53, %v22_v52  ;;  %v1065_v58 = vrot.slane %v18_v53, %v30_v54  ;;  %v1067_v59 = vrot.slane %v18_v53, %v26_v55  ;;  %v1069_v60 = vrot.slane %v18_v53, %v34_v56 }
  0x1e   :  { %729 = vmatpush1.bf16.msra.mxu0 %v728_v24 }
  0x1f   :  { %761 = vmatpush1.bf16.msra.mxu1 %v760_v25  ;;  %731 = vmatprep.subr.bf16.mxu0 %v730_v26 }
  0x20   :  { %763 = vmatprep.subr.bf16.mxu1 %v762_v29 }
  0x22   :  { %733 = vmatpush1.bf16.msra.mxu0 %v732_v32 }
  0x23   :  { %765 = vmatpush1.bf16.msra.mxu1 %v764_v33 }
  0x25   :  { %313 = vmatmul.mubr.f32.vlgmr.msra.gmra.mrb[0].mxu0 %v168_v34 }
  0x26   :  { %474 = vmatmul.mubr.f32.vlgmr.msra.gmra.mrb[0].mxu1 %v168_v34  ;;  %318 = vmatprep.mubr.f32.mxu0 %v767_v3 }
  0x27   :  { %479 = vmatprep.mubr.f32.mxu1 %v767_v3 }
  0x29   :  { %319 = vmatmul.mubr.f32.gmra.mrb[2].mxu0 %v169_v35 }
  0x2a   :  { %480 = vmatmul.mubr.f32.gmra.mrb[2].mxu1 %v169_v35  ;;  %324 = vmatprep.mubr.f32.mxu0 %v767_v3 }
  0x2b   :  { %485 = vmatprep.mubr.f32.mxu1 %v767_v3 }
  0x2d   :  { %325 = vmatmul.mubr.f32.gmra.mrb[4].mxu0 %v170_v36 }
  0x2e   :  { %486 = vmatmul.mubr.f32.gmra.mrb[4].mxu1 %v170_v36  ;;  %330 = vmatprep.mubr.f32.mxu0 %v767_v3 }
  0x2f   :  { %491 = vmatprep.mubr.f32.mxu1 %v767_v3 }
  0x31   :  { %331 = vmatmul.mubr.f32.gmra.mrb[6].mxu0 %v171_v37 }
  0x32   :  { %492 = vmatmul.mubr.f32.gmra.mrb[6].mxu1 %v171_v37  ;;  %336 = vmatprep.mubr.f32.mxu0 %v767_v3 }
  0x33   :  { %497 = vmatprep.mubr.f32.mxu1 %v767_v3 }
  0x35   :  { %337 = vmatmul.mubr.f32.gmra.mrb[8].mxu0 %v172_v38 }
  0x36   :  { %498 = vmatmul.mubr.f32.gmra.mrb[8].mxu1 %v172_v38  ;;  %342 = vmatprep.mubr.f32.mxu0 %v767_v3 }
  0x37   :  { %503 = vmatprep.mubr.f32.mxu1 %v767_v3 }
  0x39   :  { %343 = vmatmul.mubr.f32.gmra.mrb[10].mxu0 %v173_v39 }
  0x3a   :  { %504 = vmatmul.mubr.f32.gmra.mrb[10].mxu1 %v173_v39  ;;  %348 = vmatprep.mubr.f32.mxu0 %v767_v3 }
  0x3b   :  { %509 = vmatprep.mubr.f32.mxu1 %v767_v3 }
  0x3d   :  { %349 = vmatmul.mubr.f32.gmra.mrb[12].mxu0 %v174_v40 }
  0x3e   :  { %510 = vmatmul.mubr.f32.gmra.mrb[12].mxu1 %v174_v40  ;;  %354 = vmatprep.mubr.f32.mxu0 %v767_v3 }
  0x3f   :  { %515 = vmatprep.mubr.f32.mxu1 %v767_v3 }
  0x41   :  { %355 = vmatmul.mubr.f32.gmra.mrb[14].mxu0 %v175_v41 }
  0x42   :  { %516 = vmatmul.mubr.f32.gmra.mrb[14].mxu1 %v175_v41  ;;  %360 = vmatprep.mubr.f32.mxu0 %v767_v3 }
  0x43   :  { %521 = vmatprep.mubr.f32.mxu1 %v767_v3 }
  0x45   :  { %361 = vmatmul.mubr.f32.gmra.mrb[16].mxu0 %v176_v42 }
  0x46   :  { %522 = vmatmul.mubr.f32.gmra.mrb[16].mxu1 %v176_v42  ;;  %366 = vmatprep.mubr.f32.mxu0 %v767_v3 }
  0x47   :  { %527 = vmatprep.mubr.f32.mxu1 %v767_v3 }
  0x49   :  { %367 = vmatmul.mubr.f32.gmra.mrb[18].mxu0 %v177_v43 }
  0x4a   :  { %528 = vmatmul.mubr.f32.gmra.mrb[18].mxu1 %v177_v43  ;;  %372 = vmatprep.mubr.f32.mxu0 %v767_v3 }
  0x4b   :  { %533 = vmatprep.mubr.f32.mxu1 %v767_v3 }
  0x4d   :  { %373 = vmatmul.mubr.f32.gmra.mrb[20].mxu0 %v178_v44 }
  0x4e   :  { %534 = vmatmul.mubr.f32.gmra.mrb[20].mxu1 %v178_v44  ;;  %378 = vmatprep.mubr.f32.mxu0 %v767_v3 }
  0x4f   :  { %539 = vmatprep.mubr.f32.mxu1 %v767_v3 }
  0x51   :  { %379 = vmatmul.mubr.f32.gmra.mrb[22].mxu0 %v179_v45 }
  0x52   :  { %540 = vmatmul.mubr.f32.gmra.mrb[22].mxu1 %v179_v45  ;;  %384 = vmatprep.mubr.f32.mxu0 %v767_v3 }
  0x53   :  { %545 = vmatprep.mubr.f32.mxu1 %v767_v3 }
  0x55   :  { %385 = vmatmul.mubr.f32.gmra.mrb[24].mxu0 %v180_v46 }
  0x56   :  { %546 = vmatmul.mubr.f32.gmra.mrb[24].mxu1 %v180_v46  ;;  %390 = vmatprep.mubr.f32.mxu0 %v767_v3 }
  0x57   :  { %551 = vmatprep.mubr.f32.mxu1 %v767_v3 }
  0x59   :  { %391 = vmatmul.mubr.f32.gmra.mrb[26].mxu0 %v181_v47 }
  0x5a   :  { %552 = vmatmul.mubr.f32.gmra.mrb[26].mxu1 %v181_v47  ;;  %396 = vmatprep.mubr.f32.mxu0 %v767_v3 }
  0x5b   :  { %557 = vmatprep.mubr.f32.mxu1 %v767_v3 }
  0x5d   :  { %397 = vmatmul.mubr.f32.gmra.mrb[28].mxu0 %v182_v48 }
  0x5e   :  { %558 = vmatmul.mubr.f32.gmra.mrb[28].mxu1 %v182_v48  ;;  %402 = vmatprep.mubr.f32.mxu0 %v767_v3 }
  0x5f   :  { %563 = vmatprep.mubr.f32.mxu1 %v767_v3 }
  0x61   :  { %403 = vmatmul.mubr.f32.gmra.mrb[30].mxu0 %v183_v49 }
  0x62   :  { %564 = vmatmul.mubr.f32.gmra.mrb[30].mxu1 %v183_v49 }
  0xf8   :  { %v314_v3 = vpop.f32.mrb[0].mxu0 }
  0xf9   :  { %v570_v61 = vadd.f32 %v314_v3, %v1063_v57  ;;  %v475_v62 = vpop.f32.mrb[0].mxu1  ;;  %v316_v63 = vpop.f32.mrb[1].mxu0 }
  0xfa   :  { %v572_v0 = vadd.f32 %v475_v62, %v1065_v58  ;;  %v571_v1 = vadd.f32 %v316_v63, %v1067_v59  ;;  %v477_v2 = vpop.f32.mrb[1].mxu1 }
  0xfb   :  { %634 = vst [vmem:[%s1330_s3] sm:$0xff] %v570_v61  ;;  %v573_v4 = vadd.f32 %v477_v2, %v1069_v60 }
  0xfc   :  { %636 = vst [vmem:[%s1330_s3 + $0x10] sm:$0xff] %v572_v0  ;;  %635 = vst [vmem:[%s1330_s3 + $0x8] sm:$0xff] %v571_v1  ;;  %v320_v5 = vpop.f32.mrb[2].mxu0 }
  0xfd   :  { %637 = vst [vmem:[%s1330_s3 + $0x18] sm:$0xff] %v573_v4  ;;  %v574_v6 = vadd.f32 %v320_v5, %v1063_v57  ;;  %v481_v7 = vpop.f32.mrb[2].mxu1  ;;  %v322_v8 = vpop.f32.mrb[3].mxu0 }
  0xfe   :  { %v576_v9 = vadd.f32 %v481_v7, %v1065_v58  ;;  %v575_v10 = vadd.f32 %v322_v8, %v1067_v59  ;;  %v483_v11 = vpop.f32.mrb[3].mxu1 }
  0xff   :  { %638 = vst [vmem:[%s1330_s3 + $0x20] sm:$0xff] %v574_v6  ;;  %v577_v12 = vadd.f32 %v483_v11, %v1069_v60 }
 0x100   :  { %640 = vst [vmem:[%s1330_s3 + $0x30] sm:$0xff] %v576_v9  ;;  %639 = vst [vmem:[%s1330_s3 + $0x28] sm:$0xff] %v575_v10  ;;  %v326_v13 = vpop.f32.mrb[4].mxu0 }
 0x101   :  { %641 = vst [vmem:[%s1330_s3 + $0x38] sm:$0xff] %v577_v12  ;;  %v578_v14 = vadd.f32 %v326_v13, %v1063_v57  ;;  %v487_v15 = vpop.f32.mrb[4].mxu1  ;;  %v328_v16 = vpop.f32.mrb[5].mxu0 }
 0x102   :  { %v580_v17 = vadd.f32 %v487_v15, %v1065_v58  ;;  %v579_v18 = vadd.f32 %v328_v16, %v1067_v59  ;;  %v489_v19 = vpop.f32.mrb[5].mxu1 }
 0x103   :  { %642 = vst [vmem:[%s1330_s3 + $0x40] sm:$0xff] %v578_v14  ;;  %v581_v20 = vadd.f32 %v489_v19, %v1069_v60 }
 0x104   :  { %644 = vst [vmem:[%s1330_s3 + $0x50] sm:$0xff] %v580_v17  ;;  %643 = vst [vmem:[%s1330_s3 + $0x48] sm:$0xff] %v579_v18  ;;  %v332_v21 = vpop.f32.mrb[6].mxu0 }
 0x105   :  { %645 = vst [vmem:[%s1330_s3 + $0x58] sm:$0xff] %v581_v20  ;;  %v582_v22 = vadd.f32 %v332_v21, %v1063_v57  ;;  %v493_v23 = vpop.f32.mrb[6].mxu1  ;;  %v334_v24 = vpop.f32.mrb[7].mxu0 }
 0x106   :  { %v584_v25 = vadd.f32 %v493_v23, %v1065_v58  ;;  %v583_v26 = vadd.f32 %v334_v24, %v1067_v59  ;;  %v495_v27 = vpop.f32.mrb[7].mxu1 }
 0x107   :  { %646 = vst [vmem:[%s1330_s3 + $0x60] sm:$0xff] %v582_v22  ;;  %v585_v28 = vadd.f32 %v495_v27, %v1069_v60 }
 0x108   :  { %648 = vst [vmem:[%s1330_s3 + $0x70] sm:$0xff] %v584_v25  ;;  %647 = vst [vmem:[%s1330_s3 + $0x68] sm:$0xff] %v583_v26  ;;  %v338_v29 = vpop.f32.mrb[8].mxu0 }
 0x109   :  { %649 = vst [vmem:[%s1330_s3 + $0x78] sm:$0xff] %v585_v28  ;;  %v586_v30 = vadd.f32 %v338_v29, %v1063_v57  ;;  %v499_v31 = vpop.f32.mrb[8].mxu1  ;;  %v340_v32 = vpop.f32.mrb[9].mxu0 }
 0x10a   :  { %v588_v33 = vadd.f32 %v499_v31, %v1065_v58  ;;  %v587_v34 = vadd.f32 %v340_v32, %v1067_v59  ;;  %v501_v35 = vpop.f32.mrb[9].mxu1 }
 0x10b   :  { %650 = vst [vmem:[%s1330_s3 + $0x80] sm:$0xff] %v586_v30  ;;  %v589_v36 = vadd.f32 %v501_v35, %v1069_v60 }
 0x10c   :  { %652 = vst [vmem:[%s1330_s3 + $0x90] sm:$0xff] %v588_v33  ;;  %651 = vst [vmem:[%s1330_s3 + $0x88] sm:$0xff] %v587_v34  ;;  %v344_v37 = vpop.f32.mrb[10].mxu0 }
 0x10d   :  { %653 = vst [vmem:[%s1330_s3 + $0x98] sm:$0xff] %v589_v36  ;;  %v590_v38 = vadd.f32 %v344_v37, %v1063_v57  ;;  %v505_v39 = vpop.f32.mrb[10].mxu1  ;;  %v346_v40 = vpop.f32.mrb[11].mxu0 }
 0x10e   :  { %v592_v41 = vadd.f32 %v505_v39, %v1065_v58  ;;  %v591_v42 = vadd.f32 %v346_v40, %v1067_v59  ;;  %v507_v43 = vpop.f32.mrb[11].mxu1 }
 0x10f   :  { %654 = vst [vmem:[%s1330_s3 + $0xa0] sm:$0xff] %v590_v38  ;;  %v593_v44 = vadd.f32 %v507_v43, %v1069_v60 }
 0x110   :  { %656 = vst [vmem:[%s1330_s3 + $0xb0] sm:$0xff] %v592_v41  ;;  %655 = vst [vmem:[%s1330_s3 + $0xa8] sm:$0xff] %v591_v42  ;;  %v350_v45 = vpop.f32.mrb[12].mxu0 }
 0x111   :  { %657 = vst [vmem:[%s1330_s3 + $0xb8] sm:$0xff] %v593_v44  ;;  %v594_v46 = vadd.f32 %v350_v45, %v1063_v57  ;;  %v511_v47 = vpop.f32.mrb[12].mxu1  ;;  %v352_v48 = vpop.f32.mrb[13].mxu0 }
 0x112   :  { %v596_v49 = vadd.f32 %v511_v47, %v1065_v58  ;;  %v595_v50 = vadd.f32 %v352_v48, %v1067_v59  ;;  %v513_v51 = vpop.f32.mrb[13].mxu1 }
 0x113   :  { %658 = vst [vmem:[%s1330_s3 + $0xc0] sm:$0xff] %v594_v46  ;;  %v597_v52 = vadd.f32 %v513_v51, %v1069_v60 }
 0x114   :  { %660 = vst [vmem:[%s1330_s3 + $0xd0] sm:$0xff] %v596_v49  ;;  %659 = vst [vmem:[%s1330_s3 + $0xc8] sm:$0xff] %v595_v50  ;;  %v356_v53 = vpop.f32.mrb[14].mxu0 }
 0x115   :  { %661 = vst [vmem:[%s1330_s3 + $0xd8] sm:$0xff] %v597_v52  ;;  %v598_v54 = vadd.f32 %v356_v53, %v1063_v57  ;;  %v517_v55 = vpop.f32.mrb[14].mxu1  ;;  %v358_v56 = vpop.f32.mrb[15].mxu0 }
 0x116   :  { %v600_v3 = vadd.f32 %v517_v55, %v1065_v58  ;;  %v599_v61 = vadd.f32 %v358_v56, %v1067_v59  ;;  %v519_v62 = vpop.f32.mrb[15].mxu1 }
 0x117   :  { %662 = vst [vmem:[%s1330_s3 + $0xe0] sm:$0xff] %v598_v54  ;;  %v601_v63 = vadd.f32 %v519_v62, %v1069_v60 }
 0x118   :  { %664 = vst [vmem:[%s1330_s3 + $0xf0] sm:$0xff] %v600_v3  ;;  %663 = vst [vmem:[%s1330_s3 + $0xe8] sm:$0xff] %v599_v61  ;;  %v362_v0 = vpop.f32.mrb[16].mxu0 }
 0x119   :  { %665 = vst [vmem:[%s1330_s3 + $0xf8] sm:$0xff] %v601_v63  ;;  %v602_v1 = vadd.f32 %v362_v0, %v1063_v57  ;;  %v523_v2 = vpop.f32.mrb[16].mxu1  ;;  %v364_v4 = vpop.f32.mrb[17].mxu0 }
 0x11a   :  { %v604_v5 = vadd.f32 %v523_v2, %v1065_v58  ;;  %v603_v6 = vadd.f32 %v364_v4, %v1067_v59  ;;  %v525_v7 = vpop.f32.mrb[17].mxu1 }
 0x11b   :  { %666 = vst [vmem:[%s1330_s3 + $0x100] sm:$0xff] %v602_v1  ;;  %v605_v8 = vadd.f32 %v525_v7, %v1069_v60 }
 0x11c   :  { %668 = vst [vmem:[%s1330_s3 + $0x110] sm:$0xff] %v604_v5  ;;  %667 = vst [vmem:[%s1330_s3 + $0x108] sm:$0xff] %v603_v6  ;;  %v368_v9 = vpop.f32.mrb[18].mxu0 }
 0x11d   :  { %669 = vst [vmem:[%s1330_s3 + $0x118] sm:$0xff] %v605_v8  ;;  %v606_v10 = vadd.f32 %v368_v9, %v1063_v57  ;;  %v529_v11 = vpop.f32.mrb[18].mxu1  ;;  %v370_v12 = vpop.f32.mrb[19].mxu0 }
 0x11e   :  { %v608_v13 = vadd.f32 %v529_v11, %v1065_v58  ;;  %v607_v14 = vadd.f32 %v370_v12, %v1067_v59  ;;  %v531_v15 = vpop.f32.mrb[19].mxu1 }
 0x11f   :  { %670 = vst [vmem:[%s1330_s3 + $0x120] sm:$0xff] %v606_v10  ;;  %v609_v16 = vadd.f32 %v531_v15, %v1069_v60 }
 0x120   :  { %672 = vst [vmem:[%s1330_s3 + $0x130] sm:$0xff] %v608_v13  ;;  %671 = vst [vmem:[%s1330_s3 + $0x128] sm:$0xff] %v607_v14  ;;  %v374_v17 = vpop.f32.mrb[20].mxu0 }
 0x121   :  { %673 = vst [vmem:[%s1330_s3 + $0x138] sm:$0xff] %v609_v16  ;;  %v610_v18 = vadd.f32 %v374_v17, %v1063_v57  ;;  %v535_v19 = vpop.f32.mrb[20].mxu1  ;;  %v376_v20 = vpop.f32.mrb[21].mxu0 }
 0x122   :  { %v612_v21 = vadd.f32 %v535_v19, %v1065_v58  ;;  %v611_v22 = vadd.f32 %v376_v20, %v1067_v59  ;;  %v537_v23 = vpop.f32.mrb[21].mxu1 }
 0x123   :  { %674 = vst [vmem:[%s1330_s3 + $0x140] sm:$0xff] %v610_v18  ;;  %v613_v24 = vadd.f32 %v537_v23, %v1069_v60 }
 0x124   :  { %676 = vst [vmem:[%s1330_s3 + $0x150] sm:$0xff] %v612_v21  ;;  %675 = vst [vmem:[%s1330_s3 + $0x148] sm:$0xff] %v611_v22  ;;  %v380_v25 = vpop.f32.mrb[22].mxu0 }
 0x125   :  { %677 = vst [vmem:[%s1330_s3 + $0x158] sm:$0xff] %v613_v24  ;;  %v614_v26 = vadd.f32 %v380_v25, %v1063_v57  ;;  %v541_v27 = vpop.f32.mrb[22].mxu1  ;;  %v382_v28 = vpop.f32.mrb[23].mxu0 }
 0x126   :  { %v616_v29 = vadd.f32 %v541_v27, %v1065_v58  ;;  %v615_v30 = vadd.f32 %v382_v28, %v1067_v59  ;;  %v543_v31 = vpop.f32.mrb[23].mxu1 }
 0x127   :  { %678 = vst [vmem:[%s1330_s3 + $0x160] sm:$0xff] %v614_v26  ;;  %v617_v32 = vadd.f32 %v543_v31, %v1069_v60 }
 0x128   :  { %680 = vst [vmem:[%s1330_s3 + $0x170] sm:$0xff] %v616_v29  ;;  %679 = vst [vmem:[%s1330_s3 + $0x168] sm:$0xff] %v615_v30  ;;  %v386_v33 = vpop.f32.mrb[24].mxu0 }
 0x129   :  { %681 = vst [vmem:[%s1330_s3 + $0x178] sm:$0xff] %v617_v32  ;;  %v618_v34 = vadd.f32 %v386_v33, %v1063_v57  ;;  %v547_v35 = vpop.f32.mrb[24].mxu1  ;;  %v388_v36 = vpop.f32.mrb[25].mxu0 }
 0x12a   :  { %v620_v37 = vadd.f32 %v547_v35, %v1065_v58  ;;  %v619_v38 = vadd.f32 %v388_v36, %v1067_v59  ;;  %v549_v39 = vpop.f32.mrb[25].mxu1 }
 0x12b   :  { %682 = vst [vmem:[%s1330_s3 + $0x180] sm:$0xff] %v618_v34  ;;  %v621_v40 = vadd.f32 %v549_v39, %v1069_v60 }
 0x12c   :  { %684 = vst [vmem:[%s1330_s3 + $0x190] sm:$0xff] %v620_v37  ;;  %683 = vst [vmem:[%s1330_s3 + $0x188] sm:$0xff] %v619_v38  ;;  %v392_v41 = vpop.f32.mrb[26].mxu0 }
 0x12d   :  { %685 = vst [vmem:[%s1330_s3 + $0x198] sm:$0xff] %v621_v40  ;;  %v622_v42 = vadd.f32 %v392_v41, %v1063_v57  ;;  %v553_v43 = vpop.f32.mrb[26].mxu1  ;;  %v394_v44 = vpop.f32.mrb[27].mxu0 }
 0x12e   :  { %v624_v45 = vadd.f32 %v553_v43, %v1065_v58  ;;  %v623_v46 = vadd.f32 %v394_v44, %v1067_v59  ;;  %v555_v47 = vpop.f32.mrb[27].mxu1 }
 0x12f   :  { %686 = vst [vmem:[%s1330_s3 + $0x1a0] sm:$0xff] %v622_v42  ;;  %v625_v48 = vadd.f32 %v555_v47, %v1069_v60 }
 0x130   :  { %688 = vst [vmem:[%s1330_s3 + $0x1b0] sm:$0xff] %v624_v45  ;;  %687 = vst [vmem:[%s1330_s3 + $0x1a8] sm:$0xff] %v623_v46  ;;  %v398_v49 = vpop.f32.mrb[28].mxu0 }
 0x131   :  { %689 = vst [vmem:[%s1330_s3 + $0x1b8] sm:$0xff] %v625_v48  ;;  %v626_v50 = vadd.f32 %v398_v49, %v1063_v57  ;;  %v559_v51 = vpop.f32.mrb[28].mxu1  ;;  %v400_v52 = vpop.f32.mrb[29].mxu0 }
 0x132   :  { %v628_v53 = vadd.f32 %v559_v51, %v1065_v58  ;;  %v627_v54 = vadd.f32 %v400_v52, %v1067_v59  ;;  %v561_v55 = vpop.f32.mrb[29].mxu1 }
 0x133   :  { %690 = vst [vmem:[%s1330_s3 + $0x1c0] sm:$0xff] %v626_v50  ;;  %v629_v56 = vadd.f32 %v561_v55, %v1069_v60 }
 0x134   :  { %692 = vst [vmem:[%s1330_s3 + $0x1d0] sm:$0xff] %v628_v53  ;;  %691 = vst [vmem:[%s1330_s3 + $0x1c8] sm:$0xff] %v627_v54  ;;  %v404_v3 = vpop.f32.mrb[30].mxu0 }
 0x135   :  { %693 = vst [vmem:[%s1330_s3 + $0x1d8] sm:$0xff] %v629_v56  ;;  %v630_v61 = vadd.f32 %v404_v3, %v1063_v57  ;;  %v565_v62 = vpop.f32.mrb[30].mxu1  ;;  %v406_v63 = vpop.f32.mrb[31].mxu0 }
 0x136   :  { %v632_v0 = vadd.f32 %v565_v62, %v1065_v58  ;;  %v631_v1 = vadd.f32 %v406_v63, %v1067_v59  ;;  %v567_v2 = vpop.f32.mrb[31].mxu1 }
 0x137   :  { %694 = vst [vmem:[%s1330_s3 + $0x1e0] sm:$0xff] %v630_v61  ;;  %v633_v4 = vadd.f32 %v567_v2, %v1069_v60 }
 0x138   :  { %696 = vst [vmem:[%s1330_s3 + $0x1f0] sm:$0xff] %v632_v0  ;;  %695 = vst [vmem:[%s1330_s3 + $0x1e8] sm:$0xff] %v631_v1 }
 0x139   :  { %697 = vst [vmem:[%s1330_s3 + $0x1f8] sm:$0xff] %v633_v4 }

</bundles_post_ra>
